<compile_context>
chip_gen: v5e
topology: v5e:2x2
jax: 0.10.0
libtpu: 0.0.40
codegen_flags: <defaults>
</compile_context>

<pallas_src>
import functools

import jax
import jax.numpy as jnp
from jax import lax
from jax.experimental import pallas as pl
from jax.experimental.pallas import tpu as pltpu

# Loss.__init__ defaults
E_LOSS_WEIGHT = 60.0        # 2D keypoint loss weight
E_3D_LOSS_WEIGHT = 30.0     # 3D keypoint loss weight
E_POSE_LOSS_WEIGHT = 1.0    # SMPL pose loss weight
E_SHAPE_LOSS_WEIGHT = 0.001 # SMPL shape (betas) loss weight

N_J3D = 14     # keypoints 25:39
N_SMPL_J = 24

# ---- row layout of the packed (B3-lane) operand ----------------------------------
_KP3D_SIDE = 48          # per side: coord-major, each coord's 14 joints padded to 16 rows
_ROW_PKP = 0             # rows  0..47  pred kp3d
_ROW_GKP = 48            # rows 48..95  gt   kp3d
_ROW_PBETA = 96          # rows 96..105 pred betas
_ROW_GBETA = 106         # rows 106..115 gt  betas
_ROW_W3D = 116           # row 116      w_3d mask
_ROW_WSMPL = 117         # row 117      w_smpl mask
_B3_ROWS = 118


def _rodrigues_dense(tx, ty, tz):
    """batch_rodrigues (VIBE/SPIN) on sublane/lane-dense slabs.

    tx/ty/tz: (S, 128) axis-angle components.  Returns 9 rotation-matrix entries,
    each (S, 128).  Matches the reference:
      l1 = ||theta + eps||, normalized = theta / l1,
      quat = [cos(l1/2), sin(l1/2)*normalized], quat /= ||quat||, quat -> rotmat.
    Uses rsqrt + multiplies instead of sqrt + divides (single EUP slot is scarce).
    """
    txe, tye, tze = tx + 1e-8, ty + 1e-8, tz + 1e-8
    sumsq = txe * txe + tye * tye + tze * tze
    inv_angle = lax.rsqrt(sumsq)                 # 1 / ||theta + eps||
    angle = sumsq * inv_angle                    # ||theta + eps||
    nx, ny, nz = tx * inv_angle, ty * inv_angle, tz * inv_angle
    half = angle * 0.5
    qw = jnp.cos(half)
    vs = jnp.sin(half)
    qx, qy, qz = vs * nx, vs * ny, vs * nz
    inv_qn = lax.rsqrt(qw * qw + qx * qx + qy * qy + qz * qz)
    w, x, y, z = qw * inv_qn, qx * inv_qn, qy * inv_qn, qz * inv_qn
    w2, x2, y2, z2 = w * w, x * x, y * y, z * z
    wx, wy, wz = w * x, w * y, w * z
    xy, xz, yz = x * y, x * z, y * z
    return (w2 + x2 - y2 - z2, 2 * xy - 2 * wz, 2 * wy + 2 * xz,
            2 * wz + 2 * xy, w2 - x2 + y2 - z2, 2 * yz - 2 * wx,
            2 * xz - 2 * wy, 2 * wx + 2 * yz, w2 - x2 - y2 + z2)


def _loss_kernel(kp2d_ref, b3_ref, pose_ref, out_ref, *, n2, r):
    # ---------------- 2D keypoint loss (confidence-weighted MSE, mean) -------------
    # openpose_weight == gt_weight == 1.0 (module defaults) -> conf used directly.
    d2 = kp2d_ref[0:2, :] - kp2d_ref[2:4, :]          # (2, N2)
    conf = kp2d_ref[4:5, :]                            # (1, N2)
    loss_kp_2d = jnp.sum(conf * (d2 * d2)) * (1.0 / float(2 * n2))

    # ---------------- 3D keypoint loss (pelvis-aligned, masked MSE mean) -----------
    # coord-major layout: coord c occupies 16 rows (joints 0..13 + 2 zero rows).
    delta = b3_ref[_ROW_PKP:_ROW_PKP + _KP3D_SIDE, :] - \
            b3_ref[_ROW_GKP:_ROW_GKP + _KP3D_SIDE, :]          # (48, B3)
    pel_x = (delta[2:3] + delta[3:4]) * 0.5
    pel_y = (delta[18:19] + delta[19:20]) * 0.5
    pel_z = (delta[34:35] + delta[35:36]) * 0.5
    s2 = jnp.sum(delta * delta, axis=0, keepdims=True)          # (1, B3)
    s1x = jnp.sum(delta[0:16], axis=0, keepdims=True)
    s1y = jnp.sum(delta[16:32], axis=0, keepdims=True)
    s1z = jnp.sum(delta[32:48], axis=0, keepdims=True)
    # sum_{j,c}(delta_jc - pel_c)^2 == S2 - 2*sum_c pel_c*S1_c + 14*sum_c pel_c^2
    per_lane = (s2
                - 2.0 * (pel_x * s1x + pel_y * s1y + pel_z * s1z)
                + float(N_J3D) * (pel_x * pel_x + pel_y * pel_y + pel_z * pel_z))
    w3d = b3_ref[_ROW_W3D:_ROW_W3D + 1, :]                      # (1, B3)
    cnt3 = jnp.sum(w3d)
    loss_kp_3d = jnp.where(
        cnt3 > 0.0,
        jnp.sum(w3d * per_lane) / jnp.maximum(cnt3, 1.0) * (1.0 / float(N_J3D * 3)),
        0.0)

    # ---------------- SMPL pose loss (fused pred||gt Rodrigues, masked MSE mean) ---
    # pose_ref: (3, 2R, 128) with pred in rows [:R], gt in rows [R:]; masked rows and
    # padding are zero axis-angles for both sides -> identical rotmats -> zero diff.
    rot = _rodrigues_dense(pose_ref[0], pose_ref[1], pose_ref[2])
    se_pose = None
    for comp in rot:
        dd = comp[:r] - comp[r:]
        se_pose = dd * dd if se_pose is None else se_pose + dd * dd   # (R, 128)
    wsmpl = b3_ref[_ROW_WSMPL:_ROW_WSMPL + 1, :]                 # (1, B3)
    cnts = jnp.sum(wsmpl)
    inv_cnts = 1.0 / jnp.maximum(cnts, 1.0)                      # shared pose+shape
    loss_pose = jnp.where(
        cnts > 0.0,
        jnp.sum(se_pose) * inv_cnts * (1.0 / float(N_SMPL_J * 9)),
        0.0)

    # ---------------- SMPL shape loss (betas, masked MSE mean) ---------------------
    db = b3_ref[_ROW_PBETA:_ROW_PBETA + 10, :] - b3_ref[_ROW_GBETA:_ROW_GBETA + 10, :]
    se_beta = jnp.sum(db * db, axis=0, keepdims=True)            # (1, B3)
    loss_shape = jnp.where(cnts > 0.0,
                           jnp.sum(wsmpl * se_beta) * inv_cnts * 0.1,
                           0.0)

    out_ref[0] = loss_kp_2d * E_LOSS_WEIGHT
    out_ref[1] = loss_kp_3d * E_3D_LOSS_WEIGHT
    out_ref[2] = loss_pose * E_POSE_LOSS_WEIGHT
    out_ref[3] = loss_shape * E_SHAPE_LOSS_WEIGHT


def _pallas_losses(kp2d_pack, b3_pack, pose_pack, *, n2, r):
    # TODO(synk): if B3*24 or B2*K ever reach the hundreds of thousands, add a 1-D row
    # grid with partial-sum scratch (pl.when init/finalize) for DMA/compute overlap and
    # bounded per-step VMEM; at realistic loss-batch sizes the packed full-array layout
    # is <1 MiB resident, so a grid would only add per-step overhead.
    kernel = functools.partial(_loss_kernel, n2=n2, r=r)
    return pl.pallas_call(
        kernel,
        out_shape=jax.ShapeDtypeStruct((4,), jnp.float32),
        in_specs=[pl.BlockSpec(memory_space=pltpu.MemorySpace.VMEM)] * 3,
        out_specs=pl.BlockSpec(memory_space=pltpu.MemorySpace.SMEM),
    )(kp2d_pack, b3_pack, pose_pack)


def loss_forward(generator_outputs, data_2d, data_3d):
    """JAX/Pallas equivalent of Loss.forward. Glue (slicing/packing/transposes) in plain
    JAX; all reductions / elementwise hot path inside the single Pallas kernel."""
    reduce_ = lambda x: x.reshape((x.shape[0] * x.shape[1],) + x.shape[2:])

    if data_2d:
        sample_2d_count = data_2d['kp_2d'].shape[0]
        real_2d = jnp.concatenate([data_2d['kp_2d'], data_3d['kp_2d']], axis=0)
    else:
        sample_2d_count = 0
        real_2d = data_3d['kp_2d']

    seq_len = real_2d.shape[1]
    mid = seq_len // 2

    real_2d = reduce_(real_2d[:, mid:mid + 1]).astype(jnp.float32)              # (B2, K, 3)
    real_3d = reduce_(data_3d['kp_3d'][:, mid:mid + 1]).astype(jnp.float32)     # (B3, K, 3)
    real_theta = reduce_(data_3d['theta'][:, mid:mid + 1]).astype(jnp.float32)  # (B3, 85)
    w_3d = (data_3d['w_3d'][:, mid:mid + 1] != 0).reshape(-1)                   # (B3,)
    w_smpl = (data_3d['w_smpl'][:, mid:mid + 1] != 0).reshape(-1)

    preds = generator_outputs[-1]
    pred_j2d = reduce_(preds['kp_2d']).astype(jnp.float32)                      # (B2, K, 2)
    pred_j3d = reduce_(preds['kp_3d'][sample_2d_count:]).astype(jnp.float32)    # (B3, K, 3)
    pred_theta = reduce_(preds['theta'][sample_2d_count:]).astype(jnp.float32)  # (B3, 85)

    B2, K = real_2d.shape[0], real_2d.shape[1]
    B3 = real_3d.shape[0]
    N2 = B2 * K

    # ---- operand 1: 2D keypoints, (5, N2): rows = pred_x, pred_y, gt_x, gt_y, conf ----
    kp2d_pack = jnp.concatenate([pred_j2d.reshape(N2, 2).T,
                                 real_2d.reshape(N2, 3).T], axis=0)             # (5, N2)

    # ---- operand 2: everything with a B3 lane axis, (118, B3) -------------------------
    def pack_kp3d(x):
        t = jnp.transpose(x[:, 25:39, :], (2, 1, 0))      # (3, 14, B3)  coord-major
        t = jnp.pad(t, ((0, 0), (0, 2), (0, 0)))          # (3, 16, B3)  pad joints 14->16
        return t.reshape(_KP3D_SIDE, B3)                  # (48, B3)

    w3d_row = w_3d.astype(jnp.float32)[None, :]                                 # (1, B3)
    wsmpl_row = w_smpl.astype(jnp.float32)[None, :]                             # (1, B3)
    b3_pack = jnp.concatenate([pack_kp3d(pred_j3d), pack_kp3d(real_3d),
                               pred_theta[:, 75:].T, real_theta[:, 75:].T,
                               w3d_row, wsmpl_row], axis=0)                     # (118, B3)

    # ---- operand 3: fused pred||gt SMPL pose, (3, 2R, 128), zero padded ---------------
    # w_smpl mask folded in host-side: masked rows -> zero axis-angle -> identical
    # identity rotmats for pred and gt -> zero diff. Padding rows likewise zero.
    M = B3 * N_SMPL_J
    R = 8 * pl.cdiv(M, 8 * 128)           # sublane-group aligned half-height
    Mp = R * 128
    wcol = w_smpl.astype(jnp.float32)[:, None, None]                            # (B3, 1, 1)

    def pack_pose(theta):
        p = (theta[:, 3:75].reshape(B3, N_SMPL_J, 3) * wcol).reshape(M, 3)
        return jnp.pad(p, ((0, Mp - M), (0, 0)))                                # (Mp, 3)

    pose_pack = jnp.concatenate([pack_pose(pred_theta), pack_pose(real_theta)], axis=0)
    pose_pack = pose_pack.T.reshape(3, 2 * R, 128)                              # (3, 2R, 128)

    losses = _pallas_losses(kp2d_pack, b3_pack, pose_pack, n2=N2, r=R)

    # TODO(synk): when no sample has w_smpl set, torch returns None for pose/shape and
    # drops them from loss_dict; here they contribute 0 instead (same gen_loss).
    loss_dict = {
        'loss_kp_2d_local': losses[0],
        'loss_kp_3d_local': losses[1],
        'loss_pose_global': losses[2],
        'loss_shape_local': losses[3],
    }
    gen_loss = jnp.sum(losses)
    return gen_loss, loss_dict


# ------------------------------ pure-JAX reference -----------------------------------
def _batch_rodrigues_ref(theta):
    l1 = jnp.linalg.norm(theta + 1e-8, axis=1, keepdims=True)
    normalized = theta / l1
    half = l1 * 0.5
    quat = jnp.concatenate([jnp.cos(half), jnp.sin(half) * normalized], axis=1)
    quat = quat / jnp.linalg.norm(quat, axis=1, keepdims=True)
    w, x, y, z = quat[:, 0], quat[:, 1], quat[:, 2], quat[:, 3]
    w2, x2, y2, z2 = w * w, x * x, y * y, z * z
    wx, wy, wz = w * x, w * y, w * z
    xy, xz, yz = x * y, x * z, y * z
    rot = jnp.stack([w2 + x2 - y2 - z2, 2 * xy - 2 * wz, 2 * wy + 2 * xz,
                     2 * wz + 2 * xy, w2 - x2 + y2 - z2, 2 * yz - 2 * wx,
                     2 * xz - 2 * wy, 2 * wx + 2 * yz, w2 - x2 - y2 + z2], axis=1)
    return rot.reshape(-1, 3, 3)


def reference_forward(generator_outputs, data_2d, data_3d):
    reduce_ = lambda x: x.reshape((x.shape[0] * x.shape[1],) + x.shape[2:])
    sample_2d_count = data_2d['kp_2d'].shape[0] if data_2d else 0
    real_2d = (jnp.concatenate([data_2d['kp_2d'], data_3d['kp_2d']], 0)
               if data_2d else data_3d['kp_2d'])
    mid = real_2d.shape[1] // 2
    real_2d = reduce_(real_2d[:, mid:mid + 1]).astype(jnp.float32)
    real_3d = reduce_(data_3d['kp_3d'][:, mid:mid + 1]).astype(jnp.float32)
    real_theta = reduce_(data_3d['theta'][:, mid:mid + 1]).astype(jnp.float32)
    w_3d = (data_3d['w_3d'][:, mid:mid + 1] != 0).reshape(-1)
    w_smpl = (data_3d['w_smpl'][:, mid:mid + 1] != 0).reshape(-1)

    preds = generator_outputs[-1]
    pred_j2d = reduce_(preds['kp_2d']).astype(jnp.float32)
    pred_j3d = reduce_(preds['kp_3d'][sample_2d_count:]).astype(jnp.float32)
    pred_theta = reduce_(preds['theta'][sample_2d_count:]).astype(jnp.float32)

    conf = real_2d[:, :, -1:]
    loss_2d = jnp.mean(conf * (pred_j2d - real_2d[:, :, :-1]) ** 2) * E_LOSS_WEIGHT

    p = pred_j3d[w_3d][:, 25:39]
    g = real_3d[w_3d][:, 25:39]
    gp = (g[:, 2] + g[:, 3]) / 2.0
    pp = (p[:, 2] + p[:, 3]) / 2.0
    loss_3d = jnp.mean(((p - pp[:, None]) - (g - gp[:, None])) ** 2) * E_3D_LOSS_WEIGHT

    pt = pred_theta[w_smpl]
    gt = real_theta[w_smpl]
    pr = _batch_rodrigues_ref(pt[:, 3:75].reshape(-1, 3))
    gr = _batch_rodrigues_ref(gt[:, 3:75].reshape(-1, 3))
    loss_pose = jnp.mean((pr - gr) ** 2) * E_POSE_LOSS_WEIGHT
    loss_shape = jnp.mean((pt[:, 75:] - gt[:, 75:]) ** 2) * E_SHAPE_LOSS_WEIGHT
    return loss_2d + loss_3d + loss_pose + loss_shape


if __name__ == "__main__":
    key = jax.random.PRNGKey(0)
    N2, N3, T, K = 2, 3, 8, 49     # 2D-batch, 3D-batch, seq_len, #keypoints (>=39)
    B = N2 + N3

    ks = jax.random.split(key, 8)
    data_2d = {'kp_2d': jax.random.normal(ks[0], (N2, T, K, 3), jnp.float32)}
    w_3d = jnp.ones((N3, T), jnp.float32).at[1, :].set(0.0)     # mask out sample 1 for 3D kp
    w_smpl = jnp.ones((N3, T), jnp.float32).at[2, :].set(0.0)   # mask out sample 2 for SMPL
    data_3d = {
        'kp_2d': jax.random.normal(ks[1], (N3, T, K, 3), jnp.float32),
        'kp_3d': jax.random.normal(ks[2], (N3, T, K, 3), jnp.float32),
        'theta': 0.3 * jax.random.normal(ks[3], (N3, T, 85), jnp.float32),
        'w_3d': w_3d,
        'w_smpl': w_smpl,
    }
    preds = {
        'kp_2d': jax.random.normal(ks[4], (B, 1, K, 2), jnp.float32),
        'kp_3d': jax.random.normal(ks[5], (B, 1, K, 3), jnp.float32),
        'theta': 0.3 * jax.random.normal(ks[6], (B, 1, 85), jnp.float32),
    }
    generator_outputs = [preds]

    gen_loss, loss_dict = loss_forward(generator_outputs, data_2d, data_3d)
    gen_loss = jax.block_until_ready(gen_loss)

    ref = jax.block_until_ready(reference_forward(generator_outputs, data_2d, data_3d))
    assert jnp.allclose(gen_loss, ref, rtol=5e-3, atol=1e-4), (gen_loss, ref)
    assert all(jnp.isfinite(v) for v in loss_dict.values())
    print("KERNEL_OK")
</pallas_src>

<mosaic_0001>
module attributes {stable_mosaic.version = 11 : i64} {
  func.func @_loss_kernel(%arg0: memref<5x245xf32, #tpu.memory_space<vmem>>, %arg1: memref<118x3xf32, #tpu.memory_space<vmem>>, %arg2: memref<3x16x128xf32, #tpu.memory_space<vmem>>, %arg3: memref<4xf32, #tpu.memory_space<smem>>) attributes {dimension_semantics = [], scalar_prefetch = 0 : i64, scratch_operands = 0 : i64, tpu.core_type = #tpu.core_type<tc>} {
    %c0 = arith.constant 0 : index
    %c0_0 = arith.constant 0 : index
    %0 = vector.load %arg0[%c0, %c0_0] : memref<5x245xf32, #tpu.memory_space<vmem>>, vector<2x245xf32>
    %c2 = arith.constant 2 : index
    %c0_1 = arith.constant 0 : index
    %1 = vector.load %arg0[%c2, %c0_1] : memref<5x245xf32, #tpu.memory_space<vmem>>, vector<2x245xf32>
    %2 = arith.subf %0, %1 : vector<2x245xf32>
    %c4 = arith.constant 4 : index
    %c0_2 = arith.constant 0 : index
    %3 = vector.load %arg0[%c4, %c0_2] : memref<5x245xf32, #tpu.memory_space<vmem>>, vector<1x245xf32>
    %4 = arith.mulf %2, %2 : vector<2x245xf32>
    %5 = vector.broadcast %3 : vector<1x245xf32> to vector<2x245xf32>
    %6 = arith.mulf %5, %4 : vector<2x245xf32>
    %7 = vector.shape_cast %6 : vector<2x245xf32> to vector<1x2x245xf32>
    %cst = arith.constant dense<0.000000e+00> : vector<1xf32>
    %8 = vector.multi_reduction <add>, %7, %cst [1, 2] : vector<1x2x245xf32> to vector<1xf32>
    %9 = vector.shape_cast %8 : vector<1xf32> to vector<1x1x1xf32>
    %10 = vector.extract %9[0, 0, 0] : f32 from vector<1x1x1xf32>
    %cst_3 = arith.constant 0.00204081624 : f32
    %11 = arith.mulf %10, %cst_3 : f32
    %c0_4 = arith.constant 0 : index
    %c0_5 = arith.constant 0 : index
    %12 = vector.load %arg1[%c0_4, %c0_5] : memref<118x3xf32, #tpu.memory_space<vmem>>, vector<48x3xf32>
    %c48 = arith.constant 48 : index
    %c0_6 = arith.constant 0 : index
    %13 = vector.load %arg1[%c48, %c0_6] : memref<118x3xf32, #tpu.memory_space<vmem>>, vector<48x3xf32>
    %14 = arith.subf %12, %13 : vector<48x3xf32>
    %15 = vector.extract_strided_slice %14 {offsets = [2, 0], sizes = [1, 3], strides = [1, 1]} : vector<48x3xf32> to vector<1x3xf32>
    %16 = vector.extract_strided_slice %14 {offsets = [3, 0], sizes = [1, 3], strides = [1, 1]} : vector<48x3xf32> to vector<1x3xf32>
    %17 = arith.addf %15, %16 : vector<1x3xf32>
    %cst_7 = arith.constant 5.000000e-01 : f32
    %18 = vector.broadcast %cst_7 : f32 to vector<1x3xf32>
    %19 = arith.mulf %17, %18 : vector<1x3xf32>
    %20 = vector.extract_strided_slice %14 {offsets = [18, 0], sizes = [1, 3], strides = [1, 1]} : vector<48x3xf32> to vector<1x3xf32>
    %21 = vector.extract_strided_slice %14 {offsets = [19, 0], sizes = [1, 3], strides = [1, 1]} : vector<48x3xf32> to vector<1x3xf32>
    %22 = arith.addf %20, %21 : vector<1x3xf32>
    %cst_8 = arith.constant 5.000000e-01 : f32
    %23 = vector.broadcast %cst_8 : f32 to vector<1x3xf32>
    %24 = arith.mulf %22, %23 : vector<1x3xf32>
    %25 = vector.extract_strided_slice %14 {offsets = [34, 0], sizes = [1, 3], strides = [1, 1]} : vector<48x3xf32> to vector<1x3xf32>
    %26 = vector.extract_strided_slice %14 {offsets = [35, 0], sizes = [1, 3], strides = [1, 1]} : vector<48x3xf32> to vector<1x3xf32>
    %27 = arith.addf %25, %26 : vector<1x3xf32>
    %cst_9 = arith.constant 5.000000e-01 : f32
    %28 = vector.broadcast %cst_9 : f32 to vector<1x3xf32>
    %29 = arith.mulf %27, %28 : vector<1x3xf32>
    %30 = arith.mulf %14, %14 : vector<48x3xf32>
    %cst_10 = arith.constant dense<0.000000e+00> : vector<3xf32>
    %31 = vector.multi_reduction <add>, %30, %cst_10 [0] : vector<48x3xf32> to vector<3xf32>
    %32 = vector.shape_cast %31 : vector<3xf32> to vector<1x3xf32>
    %33 = vector.extract_strided_slice %14 {offsets = [0, 0], sizes = [16, 3], strides = [1, 1]} : vector<48x3xf32> to vector<16x3xf32>
    %cst_11 = arith.constant dense<0.000000e+00> : vector<3xf32>
    %34 = vector.multi_reduction <add>, %33, %cst_11 [0] : vector<16x3xf32> to vector<3xf32>
    %35 = vector.shape_cast %34 : vector<3xf32> to vector<1x3xf32>
    %36 = vector.extract_strided_slice %14 {offsets = [16, 0], sizes = [16, 3], strides = [1, 1]} : vector<48x3xf32> to vector<16x3xf32>
    %cst_12 = arith.constant dense<0.000000e+00> : vector<3xf32>
    %37 = vector.multi_reduction <add>, %36, %cst_12 [0] : vector<16x3xf32> to vector<3xf32>
    %38 = vector.shape_cast %37 : vector<3xf32> to vector<1x3xf32>
    %39 = vector.extract_strided_slice %14 {offsets = [32, 0], sizes = [16, 3], strides = [1, 1]} : vector<48x3xf32> to vector<16x3xf32>
    %cst_13 = arith.constant dense<0.000000e+00> : vector<3xf32>
    %40 = vector.multi_reduction <add>, %39, %cst_13 [0] : vector<16x3xf32> to vector<3xf32>
    %41 = vector.shape_cast %40 : vector<3xf32> to vector<1x3xf32>
    %42 = arith.mulf %19, %35 : vector<1x3xf32>
    %43 = arith.mulf %24, %38 : vector<1x3xf32>
    %44 = arith.addf %42, %43 : vector<1x3xf32>
    %45 = arith.mulf %29, %41 : vector<1x3xf32>
    %46 = arith.addf %44, %45 : vector<1x3xf32>
    %cst_14 = arith.constant 2.000000e+00 : f32
    %47 = vector.broadcast %cst_14 : f32 to vector<1x3xf32>
    %48 = arith.mulf %47, %46 : vector<1x3xf32>
    %49 = arith.subf %32, %48 : vector<1x3xf32>
    %50 = arith.mulf %19, %19 : vector<1x3xf32>
    %51 = arith.mulf %24, %24 : vector<1x3xf32>
    %52 = arith.addf %50, %51 : vector<1x3xf32>
    %53 = arith.mulf %29, %29 : vector<1x3xf32>
    %54 = arith.addf %52, %53 : vector<1x3xf32>
    %cst_15 = arith.constant 1.400000e+01 : f32
    %55 = vector.broadcast %cst_15 : f32 to vector<1x3xf32>
    %56 = arith.mulf %55, %54 : vector<1x3xf32>
    %57 = arith.addf %49, %56 : vector<1x3xf32>
    %c116 = arith.constant 116 : index
    %c0_16 = arith.constant 0 : index
    %58 = vector.load %arg1[%c116, %c0_16] : memref<118x3xf32, #tpu.memory_space<vmem>>, vector<1x3xf32>
    %59 = vector.shape_cast %58 : vector<1x3xf32> to vector<1x1x3xf32>
    %cst_17 = arith.constant dense<0.000000e+00> : vector<1xf32>
    %60 = vector.multi_reduction <add>, %59, %cst_17 [1, 2] : vector<1x1x3xf32> to vector<1xf32>
    %61 = vector.shape_cast %60 : vector<1xf32> to vector<1x1x1xf32>
    %62 = vector.extract %61[0, 0, 0] : f32 from vector<1x1x1xf32>
    %cst_18 = arith.constant 0.000000e+00 : f32
    %63 = arith.cmpf ogt, %62, %cst_18 : f32
    %64 = arith.mulf %58, %57 : vector<1x3xf32>
    %65 = vector.shape_cast %64 : vector<1x3xf32> to vector<1x1x3xf32>
    %cst_19 = arith.constant dense<0.000000e+00> : vector<1xf32>
    %66 = vector.multi_reduction <add>, %65, %cst_19 [1, 2] : vector<1x1x3xf32> to vector<1xf32>
    %67 = vector.shape_cast %66 : vector<1xf32> to vector<1x1x1xf32>
    %68 = vector.extract %67[0, 0, 0] : f32 from vector<1x1x1xf32>
    %cst_20 = arith.constant 1.000000e+00 : f32
    %69 = arith.maximumf %62, %cst_20 : f32
    %70 = arith.divf %68, %69 : f32
    %cst_21 = arith.constant 0.0238095243 : f32
    %71 = arith.mulf %70, %cst_21 : f32
    %cst_22 = arith.constant 0.000000e+00 : f32
    %72 = arith.select %63, %71, %cst_22 : f32
    %c0_23 = arith.constant 0 : index
    %c0_24 = arith.constant 0 : index
    %c0_25 = arith.constant 0 : index
    %73 = vector.load %arg2[%c0_23, %c0_24, %c0_25] : memref<3x16x128xf32, #tpu.memory_space<vmem>>, vector<1x16x128xf32>
    %74 = vector.shape_cast %73 : vector<1x16x128xf32> to vector<16x128xf32>
    %c1 = arith.constant 1 : index
    %c0_26 = arith.constant 0 : index
    %c0_27 = arith.constant 0 : index
    %75 = vector.load %arg2[%c1, %c0_26, %c0_27] : memref<3x16x128xf32, #tpu.memory_space<vmem>>, vector<1x16x128xf32>
    %76 = vector.shape_cast %75 : vector<1x16x128xf32> to vector<16x128xf32>
    %c2_28 = arith.constant 2 : index
    %c0_29 = arith.constant 0 : index
    %c0_30 = arith.constant 0 : index
    %77 = vector.load %arg2[%c2_28, %c0_29, %c0_30] : memref<3x16x128xf32, #tpu.memory_space<vmem>>, vector<1x16x128xf32>
    %78 = vector.shape_cast %77 : vector<1x16x128xf32> to vector<16x128xf32>
    %cst_31 = arith.constant 9.99999993E-9 : f32
    %79 = vector.broadcast %cst_31 : f32 to vector<16x128xf32>
    %80 = arith.addf %74, %79 : vector<16x128xf32>
    %cst_32 = arith.constant 9.99999993E-9 : f32
    %81 = vector.broadcast %cst_32 : f32 to vector<16x128xf32>
    %82 = arith.addf %76, %81 : vector<16x128xf32>
    %cst_33 = arith.constant 9.99999993E-9 : f32
    %83 = vector.broadcast %cst_33 : f32 to vector<16x128xf32>
    %84 = arith.addf %78, %83 : vector<16x128xf32>
    %85 = arith.mulf %80, %80 : vector<16x128xf32>
    %86 = arith.mulf %82, %82 : vector<16x128xf32>
    %87 = arith.addf %85, %86 : vector<16x128xf32>
    %88 = arith.mulf %84, %84 : vector<16x128xf32>
    %89 = arith.addf %87, %88 : vector<16x128xf32>
    %90 = math.rsqrt %89 : vector<16x128xf32>
    %91 = arith.mulf %89, %90 : vector<16x128xf32>
    %92 = arith.mulf %74, %90 : vector<16x128xf32>
    %93 = arith.mulf %76, %90 : vector<16x128xf32>
    %94 = arith.mulf %78, %90 : vector<16x128xf32>
    %cst_34 = arith.constant 5.000000e-01 : f32
    %95 = vector.broadcast %cst_34 : f32 to vector<16x128xf32>
    %96 = arith.mulf %91, %95 : vector<16x128xf32>
    %97 = math.cos %96 : vector<16x128xf32>
    %98 = math.sin %96 : vector<16x128xf32>
    %99 = arith.mulf %98, %92 : vector<16x128xf32>
    %100 = arith.mulf %98, %93 : vector<16x128xf32>
    %101 = arith.mulf %98, %94 : vector<16x128xf32>
    %102 = arith.mulf %97, %97 : vector<16x128xf32>
    %103 = arith.mulf %99, %99 : vector<16x128xf32>
    %104 = arith.addf %102, %103 : vector<16x128xf32>
    %105 = arith.mulf %100, %100 : vector<16x128xf32>
    %106 = arith.addf %104, %105 : vector<16x128xf32>
    %107 = arith.mulf %101, %101 : vector<16x128xf32>
    %108 = arith.addf %106, %107 : vector<16x128xf32>
    %109 = math.rsqrt %108 : vector<16x128xf32>
    %110 = arith.mulf %97, %109 : vector<16x128xf32>
    %111 = arith.mulf %99, %109 : vector<16x128xf32>
    %112 = arith.mulf %100, %109 : vector<16x128xf32>
    %113 = arith.mulf %101, %109 : vector<16x128xf32>
    %114 = arith.mulf %110, %110 : vector<16x128xf32>
    %115 = arith.mulf %111, %111 : vector<16x128xf32>
    %116 = arith.mulf %112, %112 : vector<16x128xf32>
    %117 = arith.mulf %113, %113 : vector<16x128xf32>
    %118 = arith.mulf %110, %111 : vector<16x128xf32>
    %119 = arith.mulf %110, %112 : vector<16x128xf32>
    %120 = arith.mulf %110, %113 : vector<16x128xf32>
    %121 = arith.mulf %111, %112 : vector<16x128xf32>
    %122 = arith.mulf %111, %113 : vector<16x128xf32>
    %123 = arith.mulf %112, %113 : vector<16x128xf32>
    %124 = arith.addf %114, %115 : vector<16x128xf32>
    %125 = arith.subf %124, %116 : vector<16x128xf32>
    %126 = arith.subf %125, %117 : vector<16x128xf32>
    %cst_35 = arith.constant 2.000000e+00 : f32
    %127 = vector.broadcast %cst_35 : f32 to vector<16x128xf32>
    %128 = arith.mulf %127, %121 : vector<16x128xf32>
    %cst_36 = arith.constant 2.000000e+00 : f32
    %129 = vector.broadcast %cst_36 : f32 to vector<16x128xf32>
    %130 = arith.mulf %129, %120 : vector<16x128xf32>
    %131 = arith.subf %128, %130 : vector<16x128xf32>
    %cst_37 = arith.constant 2.000000e+00 : f32
    %132 = vector.broadcast %cst_37 : f32 to vector<16x128xf32>
    %133 = arith.mulf %132, %119 : vector<16x128xf32>
    %cst_38 = arith.constant 2.000000e+00 : f32
    %134 = vector.broadcast %cst_38 : f32 to vector<16x128xf32>
    %135 = arith.mulf %134, %122 : vector<16x128xf32>
    %136 = arith.addf %133, %135 : vector<16x128xf32>
    %cst_39 = arith.constant 2.000000e+00 : f32
    %137 = vector.broadcast %cst_39 : f32 to vector<16x128xf32>
    %138 = arith.mulf %137, %120 : vector<16x128xf32>
    %cst_40 = arith.constant 2.000000e+00 : f32
    %139 = vector.broadcast %cst_40 : f32 to vector<16x128xf32>
    %140 = arith.mulf %139, %121 : vector<16x128xf32>
    %141 = arith.addf %138, %140 : vector<16x128xf32>
    %142 = arith.subf %114, %115 : vector<16x128xf32>
    %143 = arith.addf %142, %116 : vector<16x128xf32>
    %144 = arith.subf %143, %117 : vector<16x128xf32>
    %cst_41 = arith.constant 2.000000e+00 : f32
    %145 = vector.broadcast %cst_41 : f32 to vector<16x128xf32>
    %146 = arith.mulf %145, %123 : vector<16x128xf32>
    %cst_42 = arith.constant 2.000000e+00 : f32
    %147 = vector.broadcast %cst_42 : f32 to vector<16x128xf32>
    %148 = arith.mulf %147, %118 : vector<16x128xf32>
    %149 = arith.subf %146, %148 : vector<16x128xf32>
    %cst_43 = arith.constant 2.000000e+00 : f32
    %150 = vector.broadcast %cst_43 : f32 to vector<16x128xf32>
    %151 = arith.mulf %150, %122 : vector<16x128xf32>
    %cst_44 = arith.constant 2.000000e+00 : f32
    %152 = vector.broadcast %cst_44 : f32 to vector<16x128xf32>
    %153 = arith.mulf %152, %119 : vector<16x128xf32>
    %154 = arith.subf %151, %153 : vector<16x128xf32>
    %cst_45 = arith.constant 2.000000e+00 : f32
    %155 = vector.broadcast %cst_45 : f32 to vector<16x128xf32>
    %156 = arith.mulf %155, %118 : vector<16x128xf32>
    %cst_46 = arith.constant 2.000000e+00 : f32
    %157 = vector.broadcast %cst_46 : f32 to vector<16x128xf32>
    %158 = arith.mulf %157, %123 : vector<16x128xf32>
    %159 = arith.addf %156, %158 : vector<16x128xf32>
    %160 = arith.subf %114, %115 : vector<16x128xf32>
    %161 = arith.subf %160, %116 : vector<16x128xf32>
    %162 = arith.addf %161, %117 : vector<16x128xf32>
    %163 = vector.extract_strided_slice %126 {offsets = [0, 0], sizes = [8, 128], strides = [1, 1]} : vector<16x128xf32> to vector<8x128xf32>
    %164 = vector.extract_strided_slice %126 {offsets = [8, 0], sizes = [8, 128], strides = [1, 1]} : vector<16x128xf32> to vector<8x128xf32>
    %165 = arith.subf %163, %164 : vector<8x128xf32>
    %166 = arith.mulf %165, %165 : vector<8x128xf32>
    %167 = vector.extract_strided_slice %131 {offsets = [0, 0], sizes = [8, 128], strides = [1, 1]} : vector<16x128xf32> to vector<8x128xf32>
    %168 = vector.extract_strided_slice %131 {offsets = [8, 0], sizes = [8, 128], strides = [1, 1]} : vector<16x128xf32> to vector<8x128xf32>
    %169 = arith.subf %167, %168 : vector<8x128xf32>
    %170 = arith.mulf %169, %169 : vector<8x128xf32>
    %171 = arith.addf %166, %170 : vector<8x128xf32>
    %172 = vector.extract_strided_slice %136 {offsets = [0, 0], sizes = [8, 128], strides = [1, 1]} : vector<16x128xf32> to vector<8x128xf32>
    %173 = vector.extract_strided_slice %136 {offsets = [8, 0], sizes = [8, 128], strides = [1, 1]} : vector<16x128xf32> to vector<8x128xf32>
    %174 = arith.subf %172, %173 : vector<8x128xf32>
    %175 = arith.mulf %174, %174 : vector<8x128xf32>
    %176 = arith.addf %171, %175 : vector<8x128xf32>
    %177 = vector.extract_strided_slice %141 {offsets = [0, 0], sizes = [8, 128], strides = [1, 1]} : vector<16x128xf32> to vector<8x128xf32>
    %178 = vector.extract_strided_slice %141 {offsets = [8, 0], sizes = [8, 128], strides = [1, 1]} : vector<16x128xf32> to vector<8x128xf32>
    %179 = arith.subf %177, %178 : vector<8x128xf32>
    %180 = arith.mulf %179, %179 : vector<8x128xf32>
    %181 = arith.addf %176, %180 : vector<8x128xf32>
    %182 = vector.extract_strided_slice %144 {offsets = [0, 0], sizes = [8, 128], strides = [1, 1]} : vector<16x128xf32> to vector<8x128xf32>
    %183 = vector.extract_strided_slice %144 {offsets = [8, 0], sizes = [8, 128], strides = [1, 1]} : vector<16x128xf32> to vector<8x128xf32>
    %184 = arith.subf %182, %183 : vector<8x128xf32>
    %185 = arith.mulf %184, %184 : vector<8x128xf32>
    %186 = arith.addf %181, %185 : vector<8x128xf32>
    %187 = vector.extract_strided_slice %149 {offsets = [0, 0], sizes = [8, 128], strides = [1, 1]} : vector<16x128xf32> to vector<8x128xf32>
    %188 = vector.extract_strided_slice %149 {offsets = [8, 0], sizes = [8, 128], strides = [1, 1]} : vector<16x128xf32> to vector<8x128xf32>
    %189 = arith.subf %187, %188 : vector<8x128xf32>
    %190 = arith.mulf %189, %189 : vector<8x128xf32>
    %191 = arith.addf %186, %190 : vector<8x128xf32>
    %192 = vector.extract_strided_slice %154 {offsets = [0, 0], sizes = [8, 128], strides = [1, 1]} : vector<16x128xf32> to vector<8x128xf32>
    %193 = vector.extract_strided_slice %154 {offsets = [8, 0], sizes = [8, 128], strides = [1, 1]} : vector<16x128xf32> to vector<8x128xf32>
    %194 = arith.subf %192, %193 : vector<8x128xf32>
    %195 = arith.mulf %194, %194 : vector<8x128xf32>
    %196 = arith.addf %191, %195 : vector<8x128xf32>
    %197 = vector.extract_strided_slice %159 {offsets = [0, 0], sizes = [8, 128], strides = [1, 1]} : vector<16x128xf32> to vector<8x128xf32>
    %198 = vector.extract_strided_slice %159 {offsets = [8, 0], sizes = [8, 128], strides = [1, 1]} : vector<16x128xf32> to vector<8x128xf32>
    %199 = arith.subf %197, %198 : vector<8x128xf32>
    %200 = arith.mulf %199, %199 : vector<8x128xf32>
    %201 = arith.addf %196, %200 : vector<8x128xf32>
    %202 = vector.extract_strided_slice %162 {offsets = [0, 0], sizes = [8, 128], strides = [1, 1]} : vector<16x128xf32> to vector<8x128xf32>
    %203 = vector.extract_strided_slice %162 {offsets = [8, 0], sizes = [8, 128], strides = [1, 1]} : vector<16x128xf32> to vector<8x128xf32>
    %204 = arith.subf %202, %203 : vector<8x128xf32>
    %205 = arith.mulf %204, %204 : vector<8x128xf32>
    %206 = arith.addf %201, %205 : vector<8x128xf32>
    %c117 = arith.constant 117 : index
    %c0_47 = arith.constant 0 : index
    %207 = vector.load %arg1[%c117, %c0_47] : memref<118x3xf32, #tpu.memory_space<vmem>>, vector<1x3xf32>
    %208 = vector.shape_cast %207 : vector<1x3xf32> to vector<1x1x3xf32>
    %cst_48 = arith.constant dense<0.000000e+00> : vector<1xf32>
    %209 = vector.multi_reduction <add>, %208, %cst_48 [1, 2] : vector<1x1x3xf32> to vector<1xf32>
    %210 = vector.shape_cast %209 : vector<1xf32> to vector<1x1x1xf32>
    %211 = vector.extract %210[0, 0, 0] : f32 from vector<1x1x1xf32>
    %cst_49 = arith.constant 1.000000e+00 : f32
    %212 = arith.maximumf %211, %cst_49 : f32
    %cst_50 = arith.constant 1.000000e+00 : f32
    %213 = arith.divf %cst_50, %212 : f32
    %cst_51 = arith.constant 0.000000e+00 : f32
    %214 = arith.cmpf ogt, %211, %cst_51 : f32
    %215 = vector.shape_cast %206 : vector<8x128xf32> to vector<1x8x128xf32>
    %cst_52 = arith.constant dense<0.000000e+00> : vector<1xf32>
    %216 = vector.multi_reduction <add>, %215, %cst_52 [1, 2] : vector<1x8x128xf32> to vector<1xf32>
    %217 = vector.shape_cast %216 : vector<1xf32> to vector<1x1x1xf32>
    %218 = vector.extract %217[0, 0, 0] : f32 from vector<1x1x1xf32>
    %219 = arith.mulf %218, %213 : f32
    %cst_53 = arith.constant 0.00462962966 : f32
    %220 = arith.mulf %219, %cst_53 : f32
    %cst_54 = arith.constant 0.000000e+00 : f32
    %221 = arith.select %214, %220, %cst_54 : f32
    %c96 = arith.constant 96 : index
    %c0_55 = arith.constant 0 : index
    %222 = vector.load %arg1[%c96, %c0_55] : memref<118x3xf32, #tpu.memory_space<vmem>>, vector<10x3xf32>
    %c106 = arith.constant 106 : index
    %c0_56 = arith.constant 0 : index
    %223 = vector.load %arg1[%c106, %c0_56] : memref<118x3xf32, #tpu.memory_space<vmem>>, vector<10x3xf32>
    %224 = arith.subf %222, %223 : vector<10x3xf32>
    %225 = arith.mulf %224, %224 : vector<10x3xf32>
    %cst_57 = arith.constant dense<0.000000e+00> : vector<3xf32>
    %226 = vector.multi_reduction <add>, %225, %cst_57 [0] : vector<10x3xf32> to vector<3xf32>
    %227 = vector.shape_cast %226 : vector<3xf32> to vector<1x3xf32>
    %cst_58 = arith.constant 0.000000e+00 : f32
    %228 = arith.cmpf ogt, %211, %cst_58 : f32
    %229 = arith.mulf %207, %227 : vector<1x3xf32>
    %230 = vector.shape_cast %229 : vector<1x3xf32> to vector<1x1x3xf32>
    %cst_59 = arith.constant dense<0.000000e+00> : vector<1xf32>
    %231 = vector.multi_reduction <add>, %230, %cst_59 [1, 2] : vector<1x1x3xf32> to vector<1xf32>
    %232 = vector.shape_cast %231 : vector<1xf32> to vector<1x1x1xf32>
    %233 = vector.extract %232[0, 0, 0] : f32 from vector<1x1x1xf32>
    %234 = arith.mulf %233, %213 : f32
    %cst_60 = arith.constant 1.000000e-01 : f32
    %235 = arith.mulf %234, %cst_60 : f32
    %cst_61 = arith.constant 0.000000e+00 : f32
    %236 = arith.select %228, %235, %cst_61 : f32
    %cst_62 = arith.constant 6.000000e+01 : f32
    %237 = arith.mulf %11, %cst_62 : f32
    %c0_63 = arith.constant 0 : index
    %238 = memref.load %arg3[%c0_63] : memref<4xf32, #tpu.memory_space<smem>>
    memref.store %237, %arg3[%c0_63] : memref<4xf32, #tpu.memory_space<smem>>
    %cst_64 = arith.constant 3.000000e+01 : f32
    %239 = arith.mulf %72, %cst_64 : f32
    %c1_65 = arith.constant 1 : index
    %240 = memref.load %arg3[%c1_65] : memref<4xf32, #tpu.memory_space<smem>>
    memref.store %239, %arg3[%c1_65] : memref<4xf32, #tpu.memory_space<smem>>
    %cst_66 = arith.constant 1.000000e+00 : f32
    %241 = arith.mulf %221, %cst_66 : f32
    %c2_67 = arith.constant 2 : index
    %242 = memref.load %arg3[%c2_67] : memref<4xf32, #tpu.memory_space<smem>>
    memref.store %241, %arg3[%c2_67] : memref<4xf32, #tpu.memory_space<smem>>
    %cst_68 = arith.constant 1.000000e-03 : f32
    %243 = arith.mulf %236, %cst_68 : f32
    %c3 = arith.constant 3 : index
    %244 = memref.load %arg3[%c3] : memref<4xf32, #tpu.memory_space<smem>>
    memref.store %243, %arg3[%c3] : memref<4xf32, #tpu.memory_space<smem>>
    return
  }
}

</mosaic_0001>

<bundles_post_ra>
// kernel: tpu_custom_call.1
= control target key start
LH: loop header
LB: loop body
LE: loop exit
PB: predicated region body
PF: predicated region fallthrough
CT: control target
= control target key end

     0   :  { %vm38_vm0 = vcmask 1041408   ;;  %vm40_vm1 = vcmask 951296   ;;  %vm152_vm2 = vcmask 16384   ;;  %vm92_vm3 = vcmask 23552   ;;  %s1600_s0 = inlined_call_operand.vmem [shape: f32[5,245], index: 0, kind: input, shape index: {}]   ;;  %s1601_s1 = inlined_call_operand.vmem [shape: f32[118,3], index: 1, kind: input, shape index: {}]   ;;  %s1602_s2 = inlined_call_operand.vmem [shape: f32[3,16,128], index: 2, kind: input, shape index: {}]   ;;  %s1603_s3 = inlined_call_operand.hbm [shape: f32[4], index: 3, kind: output, shape index: {}]  }
   0x1   :  { %v15_v0 = vld [vmem:[%s1600_s0] sm:$0x3]  ;;  %v16_v1 = vld [vmem:[%s1600_s0 + $0x8] sm:$0x3]  ;;  %v17_v2 = vld [vmem:[%s1600_s0] sm:$0xc] }
   0x2   :  { %v18_v3 = vld [vmem:[%s1600_s0 + $0x8] sm:$0xc]  ;;  %v21_v4 = vrot.slane %v17_v2, 2  ;;  %v1103_v5 = vld [vmem:[%s1600_s0 + $0x4] ss:$8 sm:$0x3] }
   0x3   :  { %v22_v6 = vrot.slane %v18_v3, 2  ;;  %v32_v8 = vperm.slane %v1103_v5, 0  ;;  %v53_v9 = vld [vmem:[%s1601_s1] sm:$0xff]  ;;  %v54_v10 = vld [vmem:[%s1601_s1 + $0x8] sm:$0xff]  ;;  %v55_v11 = vld [vmem:[%s1601_s1 + $0x10] sm:$0xff]  ;;  %v33_v13 = vperm.slane %v1103_v5, 1 }
   0x4   :  { %v25_v7 = vsub.f32 %v15_v0, %v21_v4  ;;  %v56_v14 = vld [vmem:[%s1601_s1 + $0x18] sm:$0xff]  ;;  %v57_v15 = vld [vmem:[%s1601_s1 + $0x20] sm:$0xff]  ;;  %v59_v17 = vld [vmem:[%s1601_s1 + $0x30] sm:$0xff] }
   0x5   :  { %v26_v12 = vsub.f32 %v16_v1, %v22_v6  ;;  %v60_v18 = vld [vmem:[%s1601_s1 + $0x38] sm:$0xff]  ;;  %v61_v19 = vld [vmem:[%s1601_s1 + $0x40] sm:$0xff]  ;;  %v62_v21 = vld [vmem:[%s1601_s1 + $0x48] sm:$0xff]  ;;  %v65_v23 = vsub.f32 %v53_v9, %v59_v17 }
   0x6   :  { %v29_v16 = vmul.f32 %v25_v7, %v25_v7  ;;  %v63_v22 = vld [vmem:[%s1601_s1 + $0x50] sm:$0xff]  ;;  %v66_v24 = vsub.f32 %v54_v10, %v60_v18  ;;  %v67_v25 = vsub.f32 %v55_v11, %v61_v19  ;;  %v68_v27 = vsub.f32 %v56_v14, %v62_v21  ;;  %v58_v31 = vld [vmem:[%s1601_s1 + $0x28] sm:$0xff]  ;;  %v64_v32 = vld [vmem:[%s1601_s1 + $0x58] sm:$0xff] }
   0x7   :  { %v30_v20 = vmul.f32 %v26_v12, %v26_v12  ;;  %v69_v28 = vsub.f32 %v57_v15, %v63_v22  ;;  %v1249_v30 = vld [vmem:[%s1601_s1 + $0x74] sm:$0x1]  ;;  %v72_v33 = vrot.slane %v65_v23, 1  ;;  %v86_v35 = vmul.f32 %v65_v23, %v65_v23 }
   0x8   :  { %v36_v26 = vmul.f32 %v32_v8, %v29_v16  ;;  %v77_v34 = vrot.slane %v67_v25, 1  ;;  %v87_v38 = vmul.f32 %v66_v24, %v66_v24  ;;  %v88_v39 = vmul.f32 %v67_v25, %v67_v25 }
   0x9   :  { %v37_v29 = vmul.f32 %v33_v13, %v30_v20  ;;  %v82_v37 = vrot.slane %v69_v28, 1 }
   0xa   :  { %v39_v36 = vsel %vm38_vm0, %v36_v26, 0.0 }
   0xb   :  { %8 = vsyncpa [#allocation3], 0  ;;  %v41_v40 = vsel %vm40_vm1, %v37_v29, 0.0  ;;  %v89_v41 = vmul.f32 %v68_v27, %v68_v27  ;;  %v153_v43 = vsel %vm152_vm2, %v1249_v30, 0.0  ;;  %v70_v44 = vsub.f32 %v58_v31, %v64_v32  ;;  %v1272_v61 = vld [vmem:[%s1602_s2] sm:$0xff]  ;;  %v1280_v6 = vld [vmem:[%s1602_s2 + $0x8] sm:$0xff] }
   0xc   :  { %v42_v42 = vadd.f32 %v41_v40, %v39_v36  ;;  %v74_v45 = vadd.f32 %v72_v33, %v65_v23  ;;  %v90_v46 = vmul.f32 %v69_v28, %v69_v28  ;;  %v93_v47 = vsel %vm92_vm3, %v86_v35, 0.0  ;;  %v1285_v7 = vld [vmem:[%s1602_s2 + $0x10] sm:$0xff]  ;;  %v1290_v8 = vld [vmem:[%s1602_s2 + $0x18] sm:$0xff]  ;;  %v1297_v17 = vld [vmem:[%s1602_s2 + $0x20] sm:$0xff]  ;;  %s1179_s17 = smov 1.0   ;;  %s1093_s7 = sshll.u32 %s1603_s3, 4  ;;  %s1094_s7 = int_to_ptr.hbm [resolvable:$true] %s1093_s7 }
   0xd   :  { %v94_v48 = vsel %vm92_vm3, %v87_v38, 0.0  ;;  %v79_v49 = vadd.f32 %v77_v34, %v67_v25  ;;  %v84_v50 = vadd.f32 %v82_v37, %v69_v28  ;;  %v96_v52 = vsel %vm92_vm3, %v88_v39, 0.0  ;;  %v1302_v18 = vld [vmem:[%s1602_s2 + $0x28] sm:$0xff]  ;;  %s1180_s9 = smov [#allocation2]  }
   0xe   :  { %43 = vadd.xlane.f32.xlu0 %v42_v42  ;;  %v95_v51 = vadd.f32 %v94_v48, %v93_v47  ;;  %v91_v53 = vmul.f32 %v70_v44, %v70_v44  ;;  %v98_v54 = vsel %vm92_vm3, %v89_v41, 0.0  ;;  %v110_v55 = vsel %vm92_vm3, %v65_v23, 0.0 }
   0xf   :  { %v111_v56 = vsel %vm92_vm3, %v66_v24, 0.0  ;;  %v119_v59 = vsel %vm92_vm3, %v67_v25, 0.0  ;;  %v120_v60 = vsel %vm92_vm3, %v68_v27, 0.0  ;;  %v100_v62 = vsel %vm92_vm3, %v90_v46, 0.0 }
  0x10   :  { %v97_v57 = vadd.f32 %v96_v52, %v95_v51  ;;  %v112_v58 = vadd.f32 %v111_v56, %v110_v55  ;;  %v121_v63 = vadd.f32 %v120_v60, %v119_v59  ;;  %v128_v0 = vsel %vm92_vm3, %v69_v28, 0.0 }
  0x11   :  { %v129_v1 = vsel %vm92_vm3, %v70_v44, 0.0  ;;  %v75_v2 = vmul.f32 0.5, %v74_v45  ;;  %v80_v9 = vmul.f32 0.5, %v79_v49  ;;  %v102_v10 = vsel %vm92_vm3, %v91_v53, 0.0 }
  0x12   :  { %v99_v3 = vadd.f32 %v98_v54, %v97_v57  ;;  %v113_v4 = vrot.slane %v112_v58, 4  ;;  %v130_v5 = vadd.f32 %v129_v1, %v128_v0  ;;  %v122_v11 = vrot.slane %v121_v63, 4 }
  0x13   :  { %v206_v12 = vadd.f32 1e-08, %v1272_v61  ;;  %v85_v13 = vmul.f32 0.5, %v84_v50  ;;  %v207_v20 = vadd.f32 1e-08, %v1280_v6  ;;  %v144_v26 = vmul.f32 %v75_v2, %v75_v2 }
  0x14   :  { %v101_v14 = vadd.f32 %v100_v62, %v99_v3  ;;  %v114_v15 = vadd.f32 %v113_v4, %v112_v58  ;;  %v131_v16 = vrot.slane %v130_v5, 4  ;;  %v123_v19 = vadd.f32 %v122_v11, %v121_v63 }
  0x15   :  { %v208_v21 = vadd.f32 1e-08, %v1285_v7  ;;  %v209_v22 = vadd.f32 1e-08, %v1290_v8  ;;  %v210_v28 = vadd.f32 1e-08, %v1297_v17  ;;  %v212_v31 = vmul.f32 %v206_v12, %v206_v12 }
  0x16   :  { %154 = vadd.xlane.f32.xlu0 %v153_v43  ;;  %v103_v23 = vadd.f32 %v102_v10, %v101_v14  ;;  %v115_v24 = vrot.slane %v114_v15, 2  ;;  %v132_v25 = vadd.f32 %v131_v16, %v130_v5  ;;  %v124_v27 = vrot.slane %v123_v19, 2 }
  0x17   :  { %v211_v29 = vadd.f32 1e-08, %v1302_v18  ;;  %v145_v35 = vmul.f32 %v80_v9, %v80_v9  ;;  %v213_v37 = vmul.f32 %v207_v20, %v207_v20  ;;  %v214_v38 = vmul.f32 %v208_v21, %v208_v21 }
  0x18   :  { %v104_v32 = vrot.slane %v103_v23, 4  ;;  %v116_v33 = vadd.f32 %v115_v24, %v114_v15  ;;  %v133_v34 = vrot.slane %v132_v25, 2  ;;  %v125_v36 = vadd.f32 %v124_v27, %v123_v19 }
  0x19   :  { %v215_v39 = vmul.f32 %v209_v22, %v209_v22  ;;  %v218_v43 = vmul.f32 %v210_v28, %v210_v28  ;;  %v216_v45 = vadd.f32 %v214_v38, %v212_v31  ;;  %v219_v47 = vmul.f32 %v211_v29, %v211_v29  ;;  %v1004_v31 = vld [vmem:[%s1601_s1 + $0x75] sm:$0x1] }
  0x1a   :  { %v105_v40 = vadd.f32 %v104_v32, %v103_v23  ;;  %v117_v41 = vrot.slane %v116_v33, 1  ;;  %v134_v42 = vadd.f32 %v133_v34, %v132_v25  ;;  %v126_v44 = vrot.slane %v125_v36, 1 }
  0x1b   :  { %v217_v46 = vadd.f32 %v215_v39, %v213_v37  ;;  %v147_v51 = vmul.f32 %v85_v13, %v85_v13  ;;  %v146_v53 = vadd.f32 %v145_v35, %v144_v26  ;;  %v220_v54 = vadd.f32 %v218_v43, %v216_v45 }
  0x1c   :  { %v106_v48 = vrot.slane %v105_v40, 2  ;;  %v118_v49 = vadd.f32 %v117_v41, %v116_v33  ;;  %v135_v50 = vrot.slane %v134_v42, 1  ;;  %v127_v52 = vadd.f32 %v126_v44, %v125_v36 }
  0x1d   :  { %v221_v55 = vadd.f32 %v219_v47, %v217_v46  ;;  %1145 = vrsqrt.f32 %v220_v54  ;;  %v148_v0 = vadd.f32 %v147_v51, %v146_v53  ;;  %vm228_vm4 = vweird.f32 %v220_v54 }
  0x1e   :  { %v107_v56 = vadd.f32 %v106_v48, %v105_v40  ;;  %v136_v57 = vadd.f32 %v135_v50, %v134_v42  ;;  %v137_v58 = vmul.f32 %v118_v49, %v75_v2  ;;  %v138_v59 = vmul.f32 %v127_v52, %v80_v9 }
  0x1f   :  { %1147 = vrsqrt.f32 %v221_v55  ;;  %v149_v10 = vmul.f32 14.0, %v148_v0  ;;  %vm238_vm6 = vweird.f32 %v221_v55  ;;  %v1005_v34 = vsel %vm152_vm2, %v1004_v31, 0.0 }
  0x20   :  { %v108_v60 = vrot.slane %v107_v56, 1  ;;  %v140_v62 = vmul.f32 %v136_v57, %v85_v13  ;;  %v139_v63 = vadd.f32 %v138_v59, %v137_v58  ;;  %v1173_v58 = vmov 2475754826  }
  0x22   :  { %v109_v1 = vadd.f32 %v108_v60, %v107_v56  ;;  %v141_v3 = vadd.f32 %v140_v62, %v139_v63  ;;  %v1172_v56 = vmov 683565275   ;;  %v1174_v60 = vmov 2131351028  }
  0x23   :  { %v1146_v4 = vpop.eup %1145  ;;  %v1175_v63 = vmov 2102212464  }
  0x24   :  { %v142_v5 = vmul.f32 2.0, %v141_v3  ;;  %v223_v12 = vmul.f32 %v1146_v4, %v220_v54  ;;  %vm229_vm5 = vweird.f32 %v1146_v4 }
  0x25   :  { %v1148_v11 = vpop.eup %1147  ;;  %vm230_vm8 = vmor %vm228_vm4, %vm229_vm5 }
  0x26   :  { %v143_v14 = vsub.f32 %v109_v1, %v142_v5  ;;  %v233_v15 = vmul.f32 %v1148_v11, %v221_v55  ;;  %v224_v16 = vmul.f32 %v1146_v4, %v223_v12  ;;  %vm239_vm7 = vweird.f32 %v1148_v11 }
  0x27   :  { %vm240_vm9 = vmor %vm238_vm6, %vm239_vm7  ;;  %v1176_v1 = vmov 920167782  }
  0x28   :  { %v150_v19 = vadd.f32 %v149_v10, %v143_v14  ;;  %v234_v20 = vmul.f32 %v1148_v11, %v233_v15  ;;  %v225_v2 = vmul.f32 0.5, %v224_v16  ;;  %v1177_v16 = vmov 1326507024  }
  0x2a   :  { %v165_v9 = vrot.slane %v150_v19, 2  ;;  %v235_v13 = vmul.f32 0.5, %v234_v20  ;;  %v226_v21 = vsub.f32 1.5, %v225_v2 }
  0x2c   :  { %v167_v22 = vmul.f32 %v165_v9, %v1249_v30  ;;  %v236_v23 = vsub.f32 1.5, %v235_v13  ;;  %v227_v24 = vmul.f32 %v1146_v4, %v226_v21 }
  0x2e   :  { %v168_v25 = vsel %vm152_vm2, %v167_v22, 0.0  ;;  %v237_v26 = vmul.f32 %v1148_v11, %v236_v23  ;;  %v1311_v27 = vsel %vm230_vm8, %v1146_v4, %v227_v24 }
  0x2f   :  { %169 = vadd.xlane.f32.xlu1 %v168_v25  ;;  %v242_v29 = vmul.f32 %v1311_v27, %v220_v54 }
  0x30   :  { %v1313_v28 = vsel %vm240_vm9, %v1148_v11, %v237_v26 }
  0x31   :  { %v243_v30 = vmul.f32 %v1313_v28, %v221_v55  ;;  %v1320_v32 = vmul.f32 0.5, %v242_v29 }
  0x33   :  { %v1322_v33 = vmul.f32 0.5, %v243_v30  ;;  %v252_v35 = vand.u32 2147483647, %v1320_v32  ;;  %v255_v36 = vand.u32 2139095040, %v1320_v32 }
  0x35   :  { %v406_v37 = vand.u32 2147483647, %v1322_v33  ;;  %v409_v38 = vand.u32 2139095040, %v1322_v33  ;;  %v256_v39 = vshrl.u32 %v255_v36, 23  ;;  %v259_v40 = vand.u32 8388607, %v252_v35 }
  0x37   :  { %1006 = vadd.xlane.f32.xlu1 %v1005_v34  ;;  %v410_v41 = vshrl.u32 %v409_v38, 23  ;;  %v1108_v42 = vadd.s32 4294967169, %v256_v39  ;;  %v260_v43 = vor.u32 8388608, %v259_v40  ;;  %v413_v45 = vand.u32 8388607, %v406_v37 }
  0x39   :  { %v1111_v44 = vadd.s32 4294967169, %v410_v41  ;;  %v262_v46 = vadd.s32 1, %v1108_v42  ;;  %v1333_v49 = vshll.u32 %v260_v43, 8  ;;  %v414_v50 = vor.u32 8388608, %v413_v45 }
  0x3b   :  { %v416_v47 = vadd.s32 1, %v1111_v44  ;;  %vm263_vm10 = vcmp.gt.s32.totalorder %v262_v46, 0  ;;  %v301_v4 = vand.u32 65535, %v1333_v49  ;;  %v1343_v5 = vshll.u32 %v414_v50, 8 }
  0x3c   :  { %v264_v48 = vsel %vm263_vm10, %v262_v46, 0  ;;  %v302_v14 = vshrl.u32 %v1333_v49, 16 }
  0x3d   :  { %vm417_vm11 = vcmp.gt.s32.totalorder %v416_v47, 0  ;;  %v266_v51 = vand.u32 31, %v264_v48  ;;  %v1335_v53 = vshrl.u32 %v264_v48, 5 }
  0x3e   :  { %v418_v52 = vsel %vm417_vm11, %v416_v47, 0 }
  0x3f   :  { %v1337_v54 = vand.u32 31, %v418_v52  ;;  %v267_v55 = vsub.s32 32, %v266_v51  ;;  %v269_v57 = vshll.u32 %v1172_v56, %v266_v51  ;;  %v272_v59 = vshll.u32 %v1173_v58, %v266_v51 }
  0x40   :  { %v275_v62 = vshll.u32 %v1174_v60, %v266_v51  ;;  %v278_v0 = vshll.u32 %v1175_v63, %v266_v51  ;;  %v281_v3 = vshll.u32 %v1176_v1, %v266_v51  ;;  %vm284_vm12 = vcmp.lt.s32.totalorder %v1335_v53, 1 }
  0x41   :  { %v270_v10 = vshrl.u32 %v1173_v58, %v267_v55  ;;  %v273_v11 = vshrl.u32 %v1174_v60, %v267_v55  ;;  %v276_v12 = vshrl.u32 %v1175_v63, %v267_v55  ;;  %v279_v15 = vshrl.u32 %v1176_v1, %v267_v55 }
  0x42   :  { %v282_v19 = vshrl.u32 %v1177_v16, %v267_v55  ;;  %vm287_vm13 = vcmp.lt.s32.totalorder %v1335_v53, 4  ;;  %v1352_v13 = vsub.s32 32, %v1337_v54  ;;  %v268_v21 = vshrl.u32 %v1172_v56, %v267_v55 }
  0x43   :  { %v271_v20 = vor.u32 %v270_v10, %v269_v57  ;;  %v274_v2 = vor.u32 %v273_v11, %v272_v59  ;;  %v277_v9 = vor.u32 %v276_v12, %v275_v62  ;;  %v280_v22 = vor.u32 %v279_v15, %v278_v0 }
  0x44   :  { %v283_v23 = vor.u32 %v282_v19, %v281_v3  ;;  %vm286_vm14 = vcmp.lt.s32.totalorder %v1335_v53, 3  ;;  %vm285_vm15 = vcmp.lt.s32.totalorder %v1335_v53, 2  ;;  %v1361_v26 = vshrl.u32 %v418_v52, 5 }
  0x45   :  { %v292_v24 = vsel %vm284_vm12, %v271_v20, %v274_v2  ;;  %v296_v25 = vsel %vm284_vm12, %v274_v2, %v277_v9  ;;  %v293_v29 = vsel %vm287_vm13, %v280_v22, 920167782  ;;  %v423_v30 = vshll.u32 %v1172_v56, %v1337_v54 }
  0x46   :  { %v297_v31 = vsel %vm287_vm13, %v283_v23, 1326507024  ;;  %v426_v34 = vshll.u32 %v1173_v58, %v1337_v54  ;;  %v289_v36 = vsel %vm287_vm13, %v277_v9, 2102212464  ;;  %v294_v38 = vsel %vm286_vm14, %v277_v9, %v293_v29 }
  0x47   :  { %v298_v39 = vsel %vm286_vm14, %v280_v22, %v297_v31  ;;  %v424_v40 = vshrl.u32 %v1173_v58, %v1352_v13  ;;  %v288_v41 = vsel %vm284_vm12, %v268_v21, %v271_v20  ;;  %v295_v42 = vsel %vm285_vm15, %v292_v24, %v294_v38 }
  0x48   :  { %v299_v43 = vsel %vm285_vm15, %v296_v25, %v298_v39  ;;  %v427_v44 = vshrl.u32 %v1174_v60, %v1352_v13  ;;  %v325_v47 = vand.u32 65535, %v295_v42  ;;  %v326_v48 = vshrl.u32 %v295_v42, 16 }
  0x49   :  { %v303_v45 = vand.u32 65535, %v299_v43  ;;  %v304_v46 = vshrl.u32 %v299_v43, 16  ;;  %v290_v50 = vsel %vm286_vm14, %v274_v2, %v289_v36  ;;  %v1386_v51 = vor.u32 %v424_v40, %v423_v30 }
  0x4a   :  { %v1388_v52 = vor.u32 %v427_v44, %v426_v34  ;;  %v429_v55 = vshll.u32 %v1174_v60, %v1337_v54  ;;  %v430_v62 = vshrl.u32 %v1175_v63, %v1352_v13  ;;  %v327_v3 = vmul.u32 %v325_v47, %v301_v4 }
  0x4b   :  { %v305_v57 = vmul.u32 %v303_v45, %v301_v4  ;;  %v306_v58 = vmul.u32 %v304_v46, %v301_v4  ;;  %v307_v59 = vmul.u32 %v303_v45, %v302_v14  ;;  %v308_v0 = vmul.u32 %v304_v46, %v302_v14 }
  0x4c   :  { %v328_v10 = vmul.u32 %v326_v48, %v301_v4  ;;  %v329_v11 = vmul.u32 %v325_v47, %v302_v14  ;;  %v330_v20 = vmul.u32 %v326_v48, %v302_v14  ;;  %v432_v24 = vshll.u32 %v1175_v63, %v1337_v54 }
  0x4d   :  { %v309_v12 = vshll.u32 %v306_v58, 16  ;;  %v310_v15 = vshrl.u32 %v306_v58, 16  ;;  %v311_v19 = vshll.u32 %v307_v59, 16  ;;  %v312_v2 = vshrl.u32 %v307_v59, 16 }
  0x4e   :  { %v331_v9 = vshll.u32 %v328_v10, 16  ;;  %v332_v21 = vshrl.u32 %v328_v10, 16  ;;  %v333_v22 = vshll.u32 %v329_v11, 16  ;;  %v334_v23 = vshrl.u32 %v329_v11, 16 }
  0x4f   :  { %vm313_vm0 = vc.u32 %v305_v57, %v309_v12  ;;  %v315_v60 = vadd.s32 %v309_v12, %v305_v57  ;;  %v1178_v25 = vmov 0   ;;  %v433_v31 = vshrl.u32 %v1176_v1, %v1352_v13 }
  0x50   :  { %v314_v29 = vsel %vm313_vm0, 1, %v1178_v25  ;;  %vm335_vm1 = vc.u32 %v327_v3, %v331_v9  ;;  %v337_v4 = vadd.s32 %v331_v9, %v327_v3  ;;  %v435_v34 = vshll.u32 %v1176_v1, %v1337_v54 }
  0x51   :  { %v316_v30 = vadd.s32 %v314_v29, %v308_v0  ;;  %vm317_vm4 = vc.u32 %v315_v60, %v311_v19  ;;  %v336_v14 = vsel %vm335_vm1, 1, %v1178_v25  ;;  %v431_v63 = vor.u32 %v430_v62, %v429_v55 }
  0x52   :  { %v318_v36 = vsel %vm317_vm4, 1, %v1178_v25  ;;  %v338_v38 = vadd.s32 %v336_v14, %v330_v20  ;;  %vm339_vm5 = vc.u32 %v337_v4, %v333_v22  ;;  %v434_v42 = vor.u32 %v433_v31, %v432_v24 }
  0x53   :  { %v320_v39 = vadd.s32 %v318_v36, %v316_v30  ;;  %v340_v40 = vsel %vm339_vm5, 1, %v1178_v25  ;;  %v436_v43 = vshrl.u32 %v1177_v16, %v1352_v13  ;;  %v1405_v44 = vadd.s32 %v337_v4, %v333_v22 }
  0x54   :  { %v342_v45 = vadd.s32 %v340_v40, %v338_v38  ;;  %vm438_vm6 = vcmp.lt.s32.totalorder %v1361_v26, 1  ;;  %vm440_vm7 = vcmp.lt.s32.totalorder %v1361_v26, 3  ;;  %vm439_vm8 = vcmp.lt.s32.totalorder %v1361_v26, 2 }
  0x55   :  { %v321_v54 = vadd.s32 %v320_v39, %v310_v15  ;;  %v437_v1 = vor.u32 %v436_v43, %v435_v34  ;;  %vm441_vm9 = vcmp.lt.s32.totalorder %v1361_v26, 4  ;;  %v291_v46 = vsel %vm285_vm15, %v288_v41, %v290_v50 }
  0x56   :  { %v343_v47 = vadd.s32 %v342_v45, %v332_v21  ;;  %v446_v16 = vsel %vm438_vm6, %v1386_v51, %v1388_v52  ;;  %v447_v48 = vsel %vm441_vm9, %v434_v42, 920167782  ;;  %v450_v58 = vsel %vm438_vm6, %v1388_v52, %v431_v63 }
  0x57   :  { %v1419_v55 = vadd.s32 %v321_v54, %v312_v2  ;;  %v448_v57 = vsel %vm440_vm7, %v431_v63, %v447_v48  ;;  %v455_v53 = vand.u32 65535, %v1343_v5  ;;  %v451_v59 = vsel %vm441_vm9, %v437_v1, 1326507024 }
  0x58   :  { %v344_v41 = vadd.s32 %v343_v47, %v334_v23  ;;  %v449_v50 = vsel %vm439_vm8, %v446_v16, %v448_v57  ;;  %v456_v62 = vshrl.u32 %v1343_v5, 16  ;;  %v345_v0 = vmul.u32 %v1333_v49, %v291_v46 }
  0x59   :  { %vm347_vm10 = vc.u32 %v1419_v55, %v1405_v44  ;;  %v452_v3 = vsel %vm440_vm7, %v434_v42, %v451_v59  ;;  %v479_v10 = vand.u32 65535, %v449_v50  ;;  %v480_v15 = vshrl.u32 %v449_v50, 16 }
  0x5a   :  { %v348_v11 = vadd.s32 1, %v344_v41  ;;  %v453_v12 = vsel %vm439_vm8, %v450_v58, %v452_v3  ;;  %v422_v9 = vshrl.u32 %v1172_v56, %v1352_v13  ;;  %v443_v24 = vsel %vm441_vm9, %v431_v63, 2102212464 }
  0x5b   :  { %v457_v19 = vand.u32 65535, %v453_v12  ;;  %v458_v20 = vshrl.u32 %v453_v12, 16  ;;  %v482_v21 = vmul.u32 %v480_v15, %v455_v53  ;;  %v483_v49 = vmul.u32 %v479_v10, %v456_v62 }
  0x5c   :  { %v349_v2 = vsel %vm347_vm10, %v348_v11, %v344_v41  ;;  %v481_v4 = vmul.u32 %v479_v10, %v455_v53  ;;  %v442_v36 = vsel %vm438_vm6, %v422_v9, %v1386_v51  ;;  %v484_v56 = vmul.u32 %v480_v15, %v456_v62 }
  0x5d   :  { %v350_v22 = vadd.s32 %v349_v2, %v345_v0  ;;  %v459_v60 = vmul.u32 %v457_v19, %v455_v53  ;;  %v460_v23 = vmul.u32 %v458_v20, %v455_v53  ;;  %v461_v29 = vmul.u32 %v457_v19, %v456_v62 }
  0x5e   :  { %v485_v31 = vshll.u32 %v482_v21, 16  ;;  %v462_v14 = vmul.u32 %v458_v20, %v456_v62  ;;  %v487_v13 = vshll.u32 %v483_v49, 16  ;;  %v444_v40 = vsel %vm440_vm7, %v1388_v52, %v443_v24 }
  0x5f   :  { %v351_v30 = vadd.s32 536870912, %v350_v22  ;;  %v463_v34 = vshll.u32 %v460_v23, 16  ;;  %v465_v38 = vshll.u32 %v461_v29, 16  ;;  %v464_v42 = vshrl.u32 %v460_v23, 16 }
  0x60   :  { %vm489_vm12 = vc.u32 %v481_v4, %v485_v31  ;;  %v491_v45 = vadd.s32 %v485_v31, %v481_v4  ;;  %v486_v47 = vshrl.u32 %v482_v21, 16  ;;  %v466_v52 = vshrl.u32 %v461_v29, 16 }
  0x61   :  { %v1446_v39 = vshrl.u32 %v351_v30, 30  ;;  %vm467_vm11 = vc.u32 %v459_v60, %v463_v34  ;;  %v469_v63 = vadd.s32 %v463_v34, %v459_v60  ;;  %v490_v51 = vsel %vm489_vm12, 1, %v1178_v25 }
  0x62   :  { %v468_v43 = vsel %vm467_vm11, 1, %v1178_v25  ;;  %v492_v16 = vadd.s32 %v490_v51, %v484_v56  ;;  %vm493_vm14 = vc.u32 %v491_v45, %v487_v13  ;;  %v488_v53 = vshrl.u32 %v483_v49, 16 }
  0x63   :  { %v353_v54 = vshll.u32 %v1446_v39, 30  ;;  %v470_v1 = vadd.s32 %v468_v43, %v462_v14  ;;  %vm471_vm13 = vc.u32 %v469_v63, %v465_v38  ;;  %v494_v58 = vsel %vm493_vm14, 1, %v1178_v25 }
  0x64   :  { %v472_v46 = vsel %vm471_vm13, 1, %v1178_v25  ;;  %v496_v41 = vadd.s32 %v494_v58, %v492_v16  ;;  %v495_v62 = vadd.s32 %v491_v45, %v487_v13  ;;  %v445_v0 = vsel %vm439_vm8, %v442_v36, %v444_v40 }
  0x65   :  { %v354_v48 = vsub.s32 %v350_v22, %v353_v54  ;;  %v474_v57 = vadd.s32 %v472_v46, %v470_v1  ;;  %v499_v19 = vmul.u32 %v1343_v5, %v445_v0  ;;  %v346_v25 = vadd.s32 %v1405_v44, %v1419_v55 }
  0x66   :  { %v497_v3 = vadd.s32 %v496_v41, %v486_v47  ;;  %v376_v56 = vsub.s32 4, %v1446_v39  ;;  %vm254_vm5 = vcmp.lt.s32.totalorder %v1320_v32, 0  ;;  %vm253_vm6 = vcmp.le.f32.partialorder %v252_v35, 0.7853982 }
  0x67   :  { %vm355_vm15 = vcmp.lt.s32.totalorder %v354_v48, 0  ;;  %v356_v50 = vsub.s32 0, %v354_v48  ;;  %v475_v59 = vadd.s32 %v474_v57, %v464_v42  ;;  %vm1472_vm8 = vcmp.le.f32.partialorder %v406_v37, 0.7853982 }
  0x68   :  { %v498_v15 = vadd.s32 %v497_v3, %v488_v53  ;;  %v377_v45 = vsel %vm254_vm5, %v376_v56, %v1446_v39  ;;  %vm408_vm9 = vcmp.lt.s32.totalorder %v1322_v33, 0  ;;  %v246_v37 = vmul.f32 %v1285_v7, %v1311_v27 }
  0x69   :  { %v357_v10 = vsel %vm355_vm15, %v356_v50, %v354_v48  ;;  %v476_v11 = vadd.s32 %v475_v59, %v466_v52 }
  0x6a   :  { %v358_v12 = vclz %v357_v10  ;;  %v502_v2 = vadd.s32 1, %v498_v15 }
  0x6b   :  { %vm501_vm0 = vc.u32 %v476_v11, %v495_v62  ;;  %v500_v47 = vadd.s32 %v495_v62, %v476_v11 }
  0x6c   :  { %v1109_v20 = vadd.s32 4294967294, %v358_v12  ;;  %v503_v9 = vsel %vm501_vm0, %v502_v2, %v498_v15  ;;  %vm395_vm0 = vweird.f32 %v1320_v32 }
  0x6d   :  { %v504_v49 = vadd.s32 %v503_v9, %v499_v19 }
  0x6e   :  { %vm1110_vm1 = vcmp.lt.s32.totalorder %v1109_v20, 0 }
  0x6f   :  { %v361_v21 = vsel %vm1110_vm1, 0, %v1109_v20  ;;  %v505_v23 = vadd.s32 536870912, %v504_v49 }
  0x70   :  { %v362_v22 = vsub.s32 32, %v361_v21  ;;  %v366_v26 = vsub.s32 4294967266, %v361_v21  ;;  %v363_v60 = vshll.u32 %v354_v48, %v361_v21  ;;  %v379_v48 = vsel %vm253_vm6, 0, %v377_v45 }
  0x71   :  { %v1461_v4 = vshrl.u32 %v505_v23, 30  ;;  %v704_v39 = vadd.s32 3, %v379_v48 }
  0x72   :  { %v364_v24 = vshrl.u32 %v346_v25, %v362_v22  ;;  %v367_v29 = vadd.s32 127, %v366_v26 }
  0x73   :  { %v507_v30 = vshll.u32 %v1461_v4, 30  ;;  %v705_v22 = vand.u32 3, %v704_v39  ;;  %v530_v56 = vsub.s32 4, %v1461_v4 }
  0x74   :  { %v365_v31 = vor.u32 %v364_v24, %v363_v60  ;;  %v368_v5 = vshll.u32 %v367_v29, 23 }
  0x75   :  { %v508_v36 = vsub.s32 %v504_v49, %v507_v30  ;;  %v396_v49 = vand.u32 3, %v379_v48  ;;  %vm710_vm11 = vcmp.eq.s32.totalorder %v705_v22, 2  ;;  %vm707_vm14 = vcmp.eq.s32.totalorder %v705_v22, 0 }
  0x76   :  { %v369_v14 = vor.u32 4788187, %v368_v5  ;;  %v372_v34 = vcvt.s32.f32 %v365_v31  ;;  %vm706_vm15 = vcmp.lt.s32.totalorder %v705_v22, 2  ;;  %v531_v7 = vsel %vm408_vm9, %v530_v56, %v1461_v4 }
  0x77   :  { %vm509_vm4 = vcmp.lt.s32.totalorder %v508_v36, 0  ;;  %v510_v55 = vsub.s32 0, %v508_v36  ;;  %vm401_vm10 = vcmp.eq.s32.totalorder %v396_v49, 2  ;;  %vm397_vm12 = vcmp.lt.s32.totalorder %v396_v49, 2 }
  0x78   :  { %v370_v44 = vand.u32 2147483647, %v369_v14  ;;  %vm398_vm13 = vcmp.eq.s32.totalorder %v396_v49, 0  ;;  %v245_v30 = vmul.f32 %v1313_v28, %v1280_v6 }
  0x79   :  { %v511_v13 = vsel %vm509_vm4, %v510_v55, %v508_v36 }
  0x7a   :  { %v373_v38 = vmul.f32 %v372_v34, %v370_v44  ;;  %v512_v63 = vclz %v511_v13  ;;  %v244_v34 = vmul.f32 %v1311_v27, %v1272_v61 }
  0x7c   :  { %v374_v40 = vxor.u32 2147483648, %v373_v38  ;;  %v1112_v54 = vadd.s32 4294967294, %v512_v63 }
  0x7e   :  { %v375_v43 = vsel %vm254_vm5, %v374_v40, %v373_v38  ;;  %vm1113_vm7 = vcmp.lt.s32.totalorder %v1112_v54, 0 }
  0x7f   :  { %v378_v51 = vsel %vm253_vm6, %v1320_v32, %v375_v43  ;;  %v515_v52 = vsel %vm1113_vm7, 0, %v1112_v54 }
  0x80   :  { %v380_v46 = vmul.f32 %v378_v51, %v378_v51  ;;  %v516_v53 = vsub.s32 32, %v515_v52  ;;  %v517_v35 = vshll.u32 %v508_v36, %v515_v52  ;;  %v520_v50 = vsub.s32 4294967266, %v515_v52 }
  0x81   :  { %v44_v42 = vpop.xlane.xlu0 %43 }
  0x82   :  { %v45_v1 = vrot.slane %v44_v42, 4  ;;  %v381_v57 = vmul.f32 -0.001358992, %v380_v46  ;;  %v388_v58 = vmul.f32 -0.00019511016, %v380_v46  ;;  %v518_v3 = vshrl.u32 %v500_v47, %v516_v53 }
  0x83   :  { %v521_v12 = vadd.s32 127, %v520_v50 }
  0x84   :  { %v46_v16 = vadd.f32 %v45_v1, %v44_v42  ;;  %v382_v59 = vadd.f32 0.041655596, %v381_v57  ;;  %v389_v0 = vadd.f32 0.008332121, %v388_v58  ;;  %v519_v62 = vor.u32 %v518_v3, %v517_v35 }
  0x85   :  { %v522_v25 = vshll.u32 %v521_v12, 23  ;;  %v533_v58 = vsel %vm1472_vm8, 0, %v531_v7 }
  0x86   :  { %v47_v41 = vrot.slane %v46_v16, 2  ;;  %v383_v19 = vmul.f32 %v382_v59, %v380_v46  ;;  %v390_v20 = vmul.f32 %v389_v0, %v380_v46  ;;  %v526_v24 = vcvt.s32.f32 %v519_v62 }
  0x87   :  { %v523_v23 = vor.u32 4788187, %v522_v25  ;;  %v550_v25 = vand.u32 3, %v533_v58 }
  0x88   :  { %v48_v10 = vadd.f32 %v47_v41, %v46_v16  ;;  %v384_v9 = vadd.f32 -0.4999988, %v383_v19  ;;  %v391_v21 = vadd.f32 -0.16666654, %v390_v20 }
  0x89   :  { %v155_v15 = vpop.xlane.xlu0 %154  ;;  %v524_v14 = vand.u32 2147483647, %v523_v23  ;;  %vm555_vm1 = vcmp.eq.s32.totalorder %v550_v25, 2  ;;  %vm551_vm5 = vcmp.lt.s32.totalorder %v550_v25, 2  ;;  %vm552_vm6 = vcmp.eq.s32.totalorder %v550_v25, 0 }
  0x8a   :  { %v156_v11 = vrot.slane %v155_v15, 4  ;;  %v49_v2 = vrot.slane %v48_v10, 1  ;;  %v385_v29 = vmul.f32 %v384_v9, %v380_v46  ;;  %v392_v31 = vmul.f32 %v391_v21, %v380_v46 }
  0x8b   :  { %v527_v38 = vmul.f32 %v526_v24, %v524_v14  ;;  %v247_v14 = vmul.f32 %v1290_v8, %v1313_v28 }
  0x8c   :  { %v157_v26 = vadd.f32 %v156_v11, %v155_v15  ;;  %v50_v60 = vadd.f32 %v49_v2, %v48_v10  ;;  %v386_v36 = vadd.f32 1.0, %v385_v29  ;;  %v393_v44 = vadd.f32 1.0, %v392_v31 }
  0x8d   :  { %v528_v42 = vxor.u32 2147483648, %v527_v38  ;;  %v859_v10 = vadd.s32 3, %v533_v58  ;;  %v1045_v58 = vld [vmem:[%s1601_s1 + $0x60] sm:$0xff] }
  0x8e   :  { %v158_v5 = vrot.slane %v157_v26, 2  ;;  %1120 = vpush %v50_v60  ;;  %v394_v13 = vmul.f32 %v393_v44, %v378_v51  ;;  %v402_v40 = vxor.u32 2147483648, %v386_v36  ;;  %v248_v51 = vmul.f32 %v1297_v17, %v1311_v27 }
  0x8f   :  { %v529_v1 = vsel %vm408_vm9, %v528_v42, %v527_v38  ;;  %v860_v9 = vand.u32 3, %v859_v10  ;;  %vm549_vm9 = vweird.f32 %v1322_v33 }
  0x90   :  { %v159_v55 = vadd.f32 %v158_v5, %v157_v26  ;;  %v399_v43 = vxor.u32 2147483648, %v394_v13  ;;  %v403_v61 = vsel %vm401_vm10, %v402_v40, %v394_v13  ;;  %v712_v45 = vsel %vm710_vm11, %v402_v40, %v394_v13 }
  0x91   :  { %v532_v47 = vsel %vm1472_vm8, %v1322_v33, %v529_v1  ;;  %vm865_vm4 = vcmp.eq.s32.totalorder %v860_v9, 2  ;;  %vm862_vm7 = vcmp.eq.s32.totalorder %v860_v9, 0  ;;  %vm861_vm8 = vcmp.lt.s32.totalorder %v860_v9, 2 }
  0x92   :  { %v160_v63 = vrot.slane %v159_v55, 1  ;;  %v400_v46 = vsel %vm398_vm13, %v386_v36, %v399_v43  ;;  %v709_v16 = vsel %vm707_vm14, %v386_v36, %v399_v43  ;;  %v534_v32 = vmul.f32 %v532_v47, %v532_v47 }
  0x93   :  { %v404_v48 = vsel %vm397_vm12, %v400_v46, %v403_v61  ;;  %v713_v52 = vsel %vm706_vm15, %v709_v16, %v712_v45  ;;  %vm1054_vm15 = vcmask 17408  }
  0x94   :  { %v161_v54 = vadd.f32 %v160_v63, %v159_v55  ;;  %v1494_v57 = vsel %vm395_vm0, nan, %v404_v48  ;;  %v714_v4 = vsel %vm395_vm0, nan, %v713_v52  ;;  %v535_v53 = vmul.f32 -0.001358992, %v534_v32 }
  0x95   :  { %v542_v35 = vmul.f32 -0.00019511016, %v534_v32  ;;  %v1498_v17 = vmul.f32 %v714_v4, %v244_v34  ;;  %v1500_v27 = vmul.f32 %v714_v4, %v246_v37  ;;  %v1502_v41 = vmul.f32 %v714_v4, %v248_v51  ;;  %v1047_v4 = vld [vmem:[%s1601_s1 + $0x6a] sm:$0xff] }
  0x96   :  { %1122 = vpush %v161_v54  ;;  %v876_v50 = vmul.f32 %v1494_v57, %v1494_v57  ;;  %v536_v59 = vadd.f32 0.041655596, %v535_v53  ;;  %v249_v34 = vmul.f32 %v1302_v18, %v1313_v28 }
  0x97   :  { %v543_v0 = vadd.f32 0.008332121, %v542_v35  ;;  %v878_v3 = vmul.f32 %v1498_v17, %v1498_v17  ;;  %v882_v39 = vmul.f32 %v1500_v27, %v1500_v27  ;;  %v886_v20 = vmul.f32 %v1502_v41, %v1502_v41 }
  0x98   :  { %v537_v12 = vmul.f32 %v536_v59, %v534_v32 }
  0x99   :  { %v544_v15 = vmul.f32 %v543_v0, %v534_v32  ;;  %v880_v19 = vadd.f32 %v878_v3, %v876_v50 }
  0x9a   :  { %v538_v62 = vadd.f32 -0.4999988, %v537_v12 }
  0x9b   :  { %v545_v11 = vadd.f32 -0.16666654, %v544_v15  ;;  %v884_v2 = vadd.f32 %v882_v39, %v880_v19 }
  0x9c   :  { %v539_v21 = vmul.f32 %v538_v62, %v534_v32 }
  0x9d   :  { %v546_v49 = vmul.f32 %v545_v11, %v534_v32  ;;  %v888_v22 = vadd.f32 %v886_v20, %v884_v2 }
  0x9e   :  { %v540_v26 = vadd.f32 1.0, %v539_v21 }
  0x9f   :  { %v547_v60 = vadd.f32 1.0, %v546_v49  ;;  %1149 = vrsqrt.f32 %v888_v22  ;;  %vm896_vm10 = vweird.f32 %v888_v22 }
  0xa0   :  { %v556_v24 = vxor.u32 2147483648, %v540_v26 }
  0xa1   :  { %v548_v23 = vmul.f32 %v547_v60, %v532_v47 }
  0xa3   :  { %v553_v29 = vxor.u32 2147483648, %v548_v23  ;;  %v557_v31 = vsel %vm555_vm1, %v556_v24, %v548_v23  ;;  %v867_v5 = vsel %vm865_vm4, %v556_v24, %v548_v23 }
  0xa5   :  { %v1150_v36 = vpop.eup %1149  ;;  %v554_v44 = vsel %vm552_vm6, %v540_v26, %v553_v29  ;;  %v864_v55 = vsel %vm862_vm7, %v540_v26, %v553_v29 }
  0xa6   :  { %v558_v38 = vsel %vm551_vm5, %v554_v44, %v557_v31  ;;  %v868_v56 = vsel %vm861_vm8, %v864_v55, %v867_v5  ;;  %v891_v37 = vmul.f32 %v1150_v36, %v888_v22  ;;  %vm897_vm11 = vweird.f32 %v1150_v36 }
  0xa7   :  { %v1519_v13 = vsel %vm549_vm9, nan, %v558_v38  ;;  %v869_v40 = vsel %vm549_vm9, nan, %v868_v56  ;;  %vm898_vm12 = vmor %vm896_vm10, %vm897_vm11 }
  0xa8   :  { %v1521_v63 = vmul.f32 %v869_v40, %v245_v30  ;;  %v1523_v6 = vmul.f32 %v869_v40, %v247_v14  ;;  %v1525_v42 = vmul.f32 %v869_v40, %v249_v34  ;;  %v877_v8 = vmul.f32 %v1519_v13, %v1519_v13 }
  0xa9   :  { %v892_v18 = vmul.f32 %v1150_v36, %v891_v37 }
  0xaa   :  { %v879_v28 = vmul.f32 %v1521_v63, %v1521_v63  ;;  %v883_v33 = vmul.f32 %v1523_v6, %v1523_v6  ;;  %v887_v45 = vmul.f32 %v1525_v42, %v1525_v42 }
  0xab   :  { %v893_v43 = vmul.f32 0.5, %v892_v18 }
  0xac   :  { %v881_v61 = vadd.f32 %v879_v28, %v877_v8 }
  0xad   :  { %v894_v54 = vsub.f32 1.5, %v893_v43 }
  0xae   :  { %v885_v1 = vadd.f32 %v883_v33, %v881_v61 }
  0xaf   :  { %v895_v7 = vmul.f32 %v1150_v36, %v894_v54 }
  0xb0   :  { %v889_v51 = vadd.f32 %v887_v45, %v885_v1 }
  0xb1   :  { %v899_v46 = vsel %vm898_vm12, %v1150_v36, %v895_v7 }
  0xb2   :  { %1151 = vrsqrt.f32 %v889_v51  ;;  %v910_v47 = vmul.f32 %v899_v46, %v1494_v57  ;;  %v912_v16 = vmul.f32 %v899_v46, %v1498_v17  ;;  %v914_v48 = vmul.f32 %v899_v46, %v1500_v27  ;;  %v1046_v57 = vld [vmem:[%s1601_s1 + $0x68] sm:$0x3]  ;;  %v1048_v17 = vld [vmem:[%s1601_s1 + $0x72] sm:$0x3] }
  0xb3   :  { %v916_v35 = vmul.f32 %v899_v46, %v1502_v41  ;;  %v1049_v27 = vsub.f32 %v1045_v58, %v1047_v4  ;;  %vm906_vm13 = vweird.f32 %v889_v51  ;;  %v1050_v15 = vsub.f32 %v1046_v57, %v1048_v17  ;;  %v170_v4 = vpop.xlane.xlu1 %169 }
  0xb4   :  { %v918_v32 = vmul.f32 %v910_v47, %v910_v47  ;;  %v920_v52 = vmul.f32 %v912_v16, %v912_v16  ;;  %v1551_v0 = vmul.f32 %v914_v48, %v914_v48  ;;  %v926_v39 = vmul.f32 %v912_v16, %v910_v47 }
  0xb5   :  { %v928_v10 = vmul.f32 %v914_v48, %v910_v47  ;;  %v930_v12 = vmul.f32 %v916_v35, %v910_v47  ;;  %v932_v19 = vmul.f32 %v914_v48, %v912_v16  ;;  %v934_v20 = vmul.f32 %v916_v35, %v912_v16 }
  0xb6   :  { %v938_v3 = vadd.f32 %v920_v52, %v918_v32  ;;  %v1553_v62 = vmul.f32 %v916_v35, %v916_v35  ;;  %v936_v11 = vmul.f32 %v916_v35, %v914_v48  ;;  %v1051_v2 = vmul.f32 %v1049_v27, %v1049_v27 }
  0xb7   :  { %v1052_v25 = vmul.f32 %v1050_v15, %v1050_v15  ;;  %v1556_v49 = vsub.f32 %v918_v32, %v920_v52  ;;  %v946_v22 = vmul.f32 2.0, %v930_v12  ;;  %v944_v60 = vmul.f32 2.0, %v932_v19 }
  0xb8   :  { %v1152_v53 = vpop.eup %1151  ;;  %v940_v21 = vsub.f32 %v938_v3, %v1551_v0  ;;  %v1559_v23 = vmul.f32 2.0, %v928_v10  ;;  %v1561_v24 = vmul.f32 2.0, %v934_v20  ;;  %v1563_v29 = vmul.f32 2.0, %v926_v39 }
  0xb9   :  { %v901_v50 = vmul.f32 %v1152_v53, %v889_v51  ;;  %vm907_vm14 = vweird.f32 %v1152_v53  ;;  %v1053_v31 = vsel %vm92_vm3, %v1051_v2, 0.0  ;;  %v1055_v5 = vsel %vm1054_vm15, %v1052_v25, 0.0 }
  0xba   :  { %vm908_vm0 = vmor %vm906_vm13, %vm907_vm14  ;;  %v942_v14 = vsub.f32 %v940_v21, %v1553_v62  ;;  %v960_v34 = vadd.f32 %v1556_v49, %v1551_v0  ;;  %v964_v36 = vmul.f32 2.0, %v936_v11  ;;  %v948_v37 = vsub.f32 %v944_v60, %v946_v22 }
  0xbb   :  { %v902_v59 = vmul.f32 %v1152_v53, %v901_v50  ;;  %v954_v40 = vadd.f32 %v1561_v24, %v1559_v23  ;;  %v956_v8 = vadd.f32 %v946_v22, %v944_v60  ;;  %v1056_v18 = vadd.f32 %v1055_v5, %v1053_v31 }
  0xbc   :  { %v974_v50 = vsub.f32 %v1556_v49, %v1551_v0  ;;  %v968_v39 = vsub.f32 %v964_v36, %v1563_v29  ;;  %v970_v0 = vsub.f32 %v1561_v24, %v1559_v23  ;;  %v972_v11 = vadd.f32 %v1563_v29, %v964_v36  ;;  %v1007_v24 = vpop.xlane.xlu1 %1006 }
  0xbd   :  { %v903_v41 = vmul.f32 0.5, %v902_v59  ;;  %v1057_v57 = vrot.slane %v1056_v18, 4  ;;  %v962_v59 = vsub.f32 %v960_v34, %v1553_v62  ;;  %v171_v23 = vrot.slane %v170_v4, 4 }
  0xbe   :  { %v976_v60 = vadd.f32 %v974_v50, %v1553_v62 }
  0xbf   :  { %s1121_s13 = spop %1120  ;;  %v904_v9 = vsub.f32 1.5, %v903_v41  ;;  %v1058_v25 = vadd.f32 %v1057_v57, %v1056_v18 }
  0xc0   :  { %s52_s14 = smul.f32 0.0020408162, %s1121_s13 }
  0xc1   :  { %v905_v26 = vmul.f32 %v1152_v53, %v904_v9  ;;  %v1059_v29 = vrot.slane %v1058_v25, 2 }
  0xc2   :  { %s1077_s15 = smul.f32 60.0, %s52_s14 }
  0xc3   :  { %v909_v30 = vsel %vm908_vm0, %v1152_v53, %v905_v26  ;;  %v1060_v62 = vadd.f32 %v1059_v29, %v1058_v25 }
  0xc4   :  { %1079 = sst [smem:[#allocation2]] %s1077_s15  ;;  %v911_v44 = vmul.f32 %v909_v30, %v1519_v13  ;;  %v913_v55 = vmul.f32 %v909_v30, %v1521_v63  ;;  %v915_v38 = vmul.f32 %v909_v30, %v1523_v6  ;;  %v917_v56 = vmul.f32 %v909_v30, %v1525_v42 }
  0xc6   :  { %v919_v28 = vmul.f32 %v911_v44, %v911_v44  ;;  %v921_v33 = vmul.f32 %v913_v55, %v913_v55  ;;  %v923_v43 = vmul.f32 %v915_v38, %v915_v38  ;;  %v925_v61 = vmul.f32 %v917_v56, %v917_v56 }
  0xc7   :  { %v927_v45 = vmul.f32 %v913_v55, %v911_v44  ;;  %v929_v54 = vmul.f32 %v915_v38, %v911_v44  ;;  %v931_v1 = vmul.f32 %v917_v56, %v911_v44  ;;  %v933_v13 = vmul.f32 %v915_v38, %v913_v55  ;;  %s1578_s16 = spop %1122 }
  0xc8   :  { %v935_v7 = vmul.f32 %v917_v56, %v913_v55  ;;  %v937_v63 = vmul.f32 %v917_v56, %v915_v38  ;;  %v939_v51 = vadd.f32 %v921_v33, %v919_v28  ;;  %v959_v6 = vsub.f32 %v919_v28, %v921_v33  ;;  %s178_s18 = smax.f32 %s1179_s17, %s1578_s16  ;;  %p163_p0 = scmp.gt.f32.partialorder %s1578_s16, 0.0 }
  0xc9   :  { %v945_v46 = vmul.f32 2.0, %v933_v13  ;;  %v947_v42 = vmul.f32 2.0, %v931_v1  ;;  %v951_v47 = vmul.f32 2.0, %v929_v54  ;;  %v967_v16 = vmul.f32 2.0, %v927_v45 }
  0xca   :  { %v941_v48 = vsub.f32 %v939_v51, %v923_v43  ;;  %v953_v32 = vmul.f32 2.0, %v935_v7  ;;  %v961_v52 = vadd.f32 %v959_v6, %v923_v43  ;;  %v965_v58 = vmul.f32 2.0, %v937_v63 }
  0xcb   :  { %v949_v53 = vsub.f32 %v945_v46, %v947_v42  ;;  %v957_v35 = vadd.f32 %v947_v42, %v945_v46  ;;  %v975_v12 = vsub.f32 %v959_v6, %v923_v43  ;;  %v179_v34 = vstv %s178_s18 }
  0xcc   :  { %v943_v17 = vsub.f32 %v941_v48, %v925_v61  ;;  %v955_v27 = vadd.f32 %v953_v32, %v951_v47  ;;  %v963_v3 = vsub.f32 %v961_v52, %v925_v61  ;;  %v969_v10 = vsub.f32 %v965_v58, %v967_v16 }
  0xcd   :  { %v980_v15 = vsub.f32 %v948_v37, %v949_v53  ;;  %v986_v20 = vsub.f32 %v956_v8, %v957_v35  ;;  %v971_v9 = vsub.f32 %v953_v32, %v951_v47  ;;  %v973_v26 = vadd.f32 %v967_v16, %v965_v58 }
  0xce   :  { %v978_v41 = vsub.f32 %v942_v14, %v943_v17  ;;  %v983_v19 = vsub.f32 %v954_v40, %v955_v27  ;;  %v989_v22 = vsub.f32 %v962_v59, %v963_v3  ;;  %v977_v31 = vadd.f32 %v975_v12, %v925_v61  ;;  %v1157_v3 = vld [vmem:[%s1601_s1 + $0x75] sm:$0x1] }
  0xcf   :  { %v981_v2 = vmul.f32 %v980_v15, %v980_v15  ;;  %v992_v5 = vsub.f32 %v968_v39, %v969_v10  ;;  %v987_v14 = vmul.f32 %v986_v20, %v986_v20  ;;  %1153 = vrcp.f32 %v179_v34 }
  0xd0   :  { %v979_v21 = vmul.f32 %v978_v41, %v978_v41  ;;  %v984_v49 = vmul.f32 %v983_v19, %v983_v19  ;;  %v990_v44 = vmul.f32 %v989_v22, %v989_v22  ;;  %v995_v55 = vsub.f32 %v970_v0, %v971_v9 }
  0xd1   :  { %v172_v38 = vadd.f32 %v171_v23, %v170_v4  ;;  %v998_v56 = vsub.f32 %v972_v11, %v973_v26  ;;  %v1001_v37 = vsub.f32 %v976_v60, %v977_v31  ;;  %v1008_v40 = vrot.slane %v1007_v24, 4 }
  0xd2   :  { %v982_v30 = vadd.f32 %v981_v2, %v979_v21  ;;  %v993_v18 = vmul.f32 %v992_v5, %v992_v5  ;;  %v996_v61 = vmul.f32 %v995_v55, %v995_v55  ;;  %vm185_vm3 = vweird.f32 %v179_v34 }
  0xd3   :  { %v173_v28 = vrot.slane %v172_v38, 2  ;;  %v1009_v33 = vadd.f32 %v1008_v40, %v1007_v24  ;;  %v999_v1 = vmul.f32 %v998_v56, %v998_v56  ;;  %v1002_v13 = vmul.f32 %v1001_v37, %v1001_v37 }
  0xd4   :  { %v985_v36 = vadd.f32 %v984_v49, %v982_v30  ;;  %v1061_v46 = vrot.slane %v1060_v62, 1  ;;  %v189_v42 = vand.u32 2147483647, %v179_v34  ;;  %v191_v47 = vand.u32 2147483648, %v179_v34 }
  0xd5   :  { %v174_v45 = vadd.f32 %v173_v28, %v172_v38  ;;  %v1154_v54 = vpop.eup %1153  ;;  %v1010_v7 = vrot.slane %v1009_v33, 2 }
  0xd6   :  { %v988_v8 = vadd.f32 %v987_v14, %v985_v36  ;;  %v181_v51 = vmul.f32 %v1154_v54, %v179_v34  ;;  %vm186_vm1 = vweird.f32 %v1154_v54  ;;  %v1062_v35 = vadd.f32 %v1061_v46, %v1060_v62 }
  0xd7   :  { %v175_v6 = vrot.slane %v174_v45, 1  ;;  %v1011_v16 = vadd.f32 %v1010_v7, %v1009_v33  ;;  %vm187_vm4 = vmor %vm185_vm3, %vm186_vm1  ;;  %v192_v50 = vor.u32 1.1754944e-38, %v191_v47  ;;  %vm190_vm5 = vcmp.eq.f32.partialorder %v189_v42, 8.507059e+37 }
  0xd8   :  { %v991_v43 = vadd.f32 %v990_v44, %v988_v8  ;;  %v182_v32 = vsub.f32 1.0, %v181_v51  ;;  %v1063_v39 = vmul.f32 %v1157_v3, %v1062_v35 }
  0xd9   :  { %v176_v52 = vadd.f32 %v175_v6, %v174_v45  ;;  %v1012_v58 = vrot.slane %v1011_v16, 1 }
  0xda   :  { %v994_v63 = vadd.f32 %v993_v18, %v991_v43  ;;  %v183_v53 = vmul.f32 %v1154_v54, %v182_v32  ;;  %v1064_v12 = vsel %vm152_vm2, %v1063_v39, 0.0 }
  0xdb   :  { %1124 = vpush %v176_v52  ;;  %v1013_v27 = vadd.f32 %v1012_v58, %v1011_v16 }
  0xdc   :  { %v997_v48 = vadd.f32 %v996_v61, %v994_v63  ;;  %v184_v17 = vadd.f32 %v1154_v54, %v183_v53 }
  0xde   :  { %v1000_v4 = vadd.f32 %v999_v1, %v997_v48  ;;  %v188_v59 = vsel %vm187_vm4, %v1154_v54, %v184_v17 }
  0xdf   :  { %v193_v10 = vsel %vm190_vm5, %v192_v50, %v188_v59 }
  0xe0   :  { %v1003_v57 = vadd.f32 %v1002_v13, %v1000_v4  ;;  %1126 = vpush %v193_v10 }
  0xe1   :  { %1128 = vpush %v1013_v27 }
  0xe2   :  { %1033 = vadd.xlane.f32.xlu2 %v1003_v57 }
  0xea   :  { %1065 = vadd.xlane.f32.xlu2 %v1064_v12 }
 0x10c   :  { %s1125_s21 = spop %1124 }
 0x111   :  { %s1127_s22 = spop %1126 }
 0x112   :  { %s195_s23 = smul.f32 %s1127_s22, %s1125_s21  ;;  %s1591_s24 = spop %1128 }
 0x113   :  { %s1015_s26 = smax.f32 %s1179_s17, %s1591_s24  ;;  %p1032_p1 = scmp.gt.f32.partialorder %s1591_s24, 0.0 }
 0x114   :  { %s196_s25 = smul.f32 0.023809524, %s195_s23  ;;  %v1016_v15 = vstv %s1015_s26 }
 0x115   :  { %1155 = vrcp.f32 %v1016_v15  ;;  %v1028_v11 = vand.u32 2147483648, %v1016_v15  ;;  %vm1022_vm2 = vweird.f32 %v1016_v15  ;;  %v1026_v25 = vand.u32 2147483647, %v1016_v15 }
 0x116   :  { %s1607_s25 = smov (!%p163_p0, %s196_s25), 0.0 }
 0x117   :  { %s1080_s27 = smul.f32 30.0, %s1607_s25  ;;  %v1029_v9 = vor.u32 1.1754944e-38, %v1028_v11  ;;  %vm1027_vm8 = vcmp.eq.f32.partialorder %v1026_v25, 8.507059e+37 }
 0x119   :  { %1082 = sst [smem:[#allocation2 + $0x1]] %s1080_s27 }
 0x11b   :  { %v1156_v41 = vpop.eup %1155 }
 0x11c   :  { %v1018_v19 = vmul.f32 %v1156_v41, %v1016_v15  ;;  %vm1023_vm6 = vweird.f32 %v1156_v41 }
 0x11d   :  { %vm1024_vm7 = vmor %vm1022_vm2, %vm1023_vm6 }
 0x11e   :  { %v1019_v20 = vsub.f32 1.0, %v1018_v19 }
 0x120   :  { %v1020_v0 = vmul.f32 %v1156_v41, %v1019_v20 }
 0x122   :  { %v1021_v2 = vadd.f32 %v1156_v41, %v1020_v0 }
 0x124   :  { %v1025_v21 = vsel %vm1024_vm7, %v1156_v41, %v1021_v2 }
 0x125   :  { %v1030_v49 = vsel %vm1027_vm8, %v1029_v9, %v1025_v21 }
 0x126   :  { %1130 = vpush %v1030_v49 }
 0x155   :  { %v1034_v22 = vpop.xlane.xlu2 %1033 }
 0x156   :  { %v1035_v26 = vrot.slane %v1034_v22, 4 }
 0x157   :  { %s1131_s1 = spop %1130 }
 0x158   :  { %v1036_v60 = vadd.f32 %v1035_v26, %v1034_v22 }
 0x15a   :  { %v1037_v31 = vrot.slane %v1036_v60, 2 }
 0x15c   :  { %v1038_v5 = vadd.f32 %v1037_v31, %v1036_v60 }
 0x15d   :  { %v1066_v30 = vpop.xlane.xlu2 %1065 }
 0x15e   :  { %v1067_v14 = vrot.slane %v1066_v30, 4  ;;  %v1039_v34 = vrot.slane %v1038_v5, 1 }
 0x160   :  { %v1068_v23 = vadd.f32 %v1067_v14, %v1066_v30  ;;  %v1040_v24 = vadd.f32 %v1039_v34, %v1038_v5 }
 0x162   :  { %v1069_v29 = vrot.slane %v1068_v23, 2  ;;  %1132 = vpush %v1040_v24 }
 0x164   :  { %v1070_v36 = vadd.f32 %v1069_v29, %v1068_v23 }
 0x166   :  { %v1071_v44 = vrot.slane %v1070_v36, 1 }
 0x168   :  { %v1072_v55 = vadd.f32 %v1071_v44, %v1070_v36 }
 0x16a   :  { %1134 = vpush %v1072_v55 }
 0x193   :  { %s1133_s28 = spop %1132 }
 0x194   :  { %s1042_s29 = smul.f32 %s1133_s28, %s1131_s1 }
 0x196   :  { %s1043_s0 = smul.f32 0.0046296297, %s1042_s29 }
 0x198   :  { %s1609_s0 = smov (!%p1032_p1, %s1043_s0), 0.0 }
 0x199   :  { %1084 = sst [smem:[#allocation2 + $0x2]] %s1609_s0 }
 0x19b   :  { %s1135_s30 = spop %1134 }
 0x19c   :  { %s1074_s2 = smul.f32 %s1135_s30, %s1131_s1 }
 0x19e   :  { %s1075_s4 = smul.f32 0.1, %s1074_s2 }
 0x1a0   :  { %s1611_s4 = smov (!%p1032_p1, %s1075_s4), 0.0 }
 0x1a1   :  { %s1085_s8 = smul.f32 0.001, %s1611_s4 }
 0x1a3   :  { %1087 = sst [smem:[#allocation2 + $0x3]] %s1085_s8 }
 0x1a4   :  { %1096 = dma.smem_to_hbm %s1180_s9, 16, %s1094_s7, [#allocation3]  }
 0x1a5   :  { %1170 = dma.done.wait [#allocation3], 16  }
 0x1a6   :  { %1171 = vsyncadd [#allocation3], 4294967280 }
 0x1a7   :  { %1101 = sfence }
 0x1a8   :  { %1102 = vsyncpa [#allocation3], 1 }

</bundles_post_ra>
